<compile_context>
chip_gen: v6e
topology: v6e:2x2x1
jax: 0.10.0
libtpu: 0.0.40
codegen_flags: <defaults>
</compile_context>

<pallas_src>
import functools

import jax
import jax.numpy as jnp
import numpy as np
from jax.experimental import pallas as pl
from jax.experimental.pallas import tpu as pltpu


VMEM_LIMIT = 48 * 1024 * 1024      # < v7x 64 MiB physical, > 32 MiB scoped default
LANE_PAD = 128                     # lane-dense padding for L / G / hidden dims
ENC_ROW_TARGET = 256               # encoder rows (batch) per grid step
PAIR_TARGET = 8192                 # target (i, j) pairs per discriminator step
PAIR_VMEM_BUDGET = 16 * 1024 * 1024


def _round_up(n, m):
    return ((n + m - 1) // m) * m


def _tile_rows(n, target):
    """Pick (tile, n_padded): tile divides n_padded, tile is a multiple of 8
    (or n itself when n <= 8), tile <= target, and the grid gets >= 2 steps
    whenever possible (v7x has two TensorCores).  Never silently returns a
    whole huge dimension: rows are padded to a multiple of 8 instead."""
    if n <= 8:
        return n, n
    n_pad = _round_up(n, 8)
    cap = max(8, (n_pad // 2) // 8 * 8)          # prefer >= 2 grid steps
    tgt = max(8, min((max(target, 8) // 8) * 8, cap))
    t = tgt
    while t > 8 and n_pad % t:
        t -= 8
    return t, n_pad


def _pair_row_target(b, h1d, h2d):
    """Rows of the row-tile so that per-step temporaries stay ~<= 16 MiB and
    pairs-per-step ~<= 8K (review: 4K-8K pair rows keeps v7x VMEM headroom)."""
    per_pair = 2 * h1d + 6 * h2d + 8 * b          # bytes of live temps / pair
    pairs = min(PAIR_TARGET, max(1, PAIR_VMEM_BUDGET // per_pair))
    return int(max(8, min(256, pairs // max(b, 1))))


# ---------------------------------------------------------------------------
# Pallas kernels
# ---------------------------------------------------------------------------

def encoder_kernel(x_ref, wl_ref, bl_ref, wg_ref, bg_ref, loc_ref, glob_ref):
    # TODO(synk): get_encoder() is not defined in the reference source; this is
    # a synthetic encoder (per-timestep dense+tanh -> locals, mean-pool over T
    # + dense+tanh -> globals) with the same (globals_, locals_) contract.
    tb, t, d = x_ref.shape
    lp = wl_ref.shape[1]
    x2 = x_ref[...].reshape(tb * t, d).astype(jnp.bfloat16)
    loc2 = jnp.tanh(
        jnp.dot(x2, wl_ref[...], preferred_element_type=jnp.float32)
        + bl_ref[...])
    loc = loc2.reshape(tb, t, lp)
    loc_ref[...] = loc                                    # (tb, T, Lp) f32
    pooled = jnp.mean(loc, axis=1)                        # (tb, Lp)
    glob_ref[...] = jnp.tanh(
        jnp.dot(pooled.astype(jnp.bfloat16), wg_ref[...],
                preferred_element_type=jnp.float32) + bg_ref[...])


def pair_mlp_kernel(rows_ref, hg_ref, w1l_ref, w2_ref, b2_ref, w3_ref, o_ref):
    """o[r, j] = Discriminator(cat(rows[r], globals[j])).

    The first layer is split (exact, before the ReLU):
        h1[r, j] = ReLU(rows[r] @ w1_loc + (globals[j] @ w1_glob + b1))
    where the globals part (hg_ref) is precomputed once in the wrapper.
    b3 rides in a spare H2 slot of b2/w3 (b2 slot = 1, w3 slot = b3).
    """
    r = rows_ref.shape[0]
    b, h1d = hg_ref.shape
    # layer 1 (split): per-row local partial + per-j global partial, bf16 temps
    h_loc = jnp.dot(rows_ref[...], w1l_ref[...],
                    preferred_element_type=jnp.float32).astype(jnp.bfloat16)
    h1 = jnp.maximum(h_loc[:, None, :] + hg_ref[...][None, :, :], 0)   # (r,b,H1)
    h1 = h1.reshape(r * b, h1d)                           # rows ordered (r, j)
    # layer 2
    h2 = jnp.maximum(
        jnp.dot(h1, w2_ref[...], preferred_element_type=jnp.float32)
        + b2_ref[...], 0.0).astype(jnp.bfloat16)          # (r*b, H2)
    # layer 3 (+ folded b3) -> (r*b, 1) column
    col = jnp.dot(h2, w3_ref[...], preferred_element_type=jnp.float32)
    # column -> lane-dense (r, b): lane-broadcast + diagonal mask + sublane sum
    big = jnp.broadcast_to(col, (r * b, b)).reshape(r, b, b)
    eye = (jax.lax.broadcasted_iota(jnp.int32, (b, b), 0)
           == jax.lax.broadcasted_iota(jnp.int32, (b, b), 1))
    o_ref[...] = jnp.sum(jnp.where(eye[None, :, :], big, 0.0), axis=1)


# ---------------------------------------------------------------------------
# Wrappers (pallas_call plumbing)
# ---------------------------------------------------------------------------

def run_encoder(x, p):
    b, t, d_in = x.shape
    lp = p["wl"].shape[1]
    gp = p["wg"].shape[1]
    tile_b, b_pad = _tile_rows(b, ENC_ROW_TARGET)
    if b_pad != b:
        x = jnp.pad(x, ((0, b_pad - b), (0, 0), (0, 0)))
    loc, glob = pl.pallas_call(
        encoder_kernel,
        out_shape=(jax.ShapeDtypeStruct((b_pad, t, lp), jnp.float32),
                   jax.ShapeDtypeStruct((b_pad, gp), jnp.float32)),
        grid=(b_pad // tile_b,),
        in_specs=[
            pl.BlockSpec((tile_b, t, d_in), lambda i: (i, 0, 0)),
            pl.BlockSpec((d_in, lp), lambda i: (0, 0)),
            pl.BlockSpec((1, lp), lambda i: (0, 0)),
            pl.BlockSpec((lp, gp), lambda i: (0, 0)),
            pl.BlockSpec((1, gp), lambda i: (0, 0)),
        ],
        out_specs=(pl.BlockSpec((tile_b, t, lp), lambda i: (i, 0, 0)),
                   pl.BlockSpec((tile_b, gp), lambda i: (i, 0))),
        compiler_params=pltpu.CompilerParams(
            dimension_semantics=("parallel",),
            vmem_limit_bytes=VMEM_LIMIT),
    )(x, p["wl"], p["bl"], p["wg"], p["bg"])
    if b_pad != b:
        loc, glob = loc[:b], glob[:b]
    return loc, glob            # feature dims are lane-padded (Lp, Gp)


def _h_glob(globals_pad, disc):
    """Per-j globals partial of layer 1 (+ b1), computed once per call in
    plain JAX instead of once per grid step; bf16 for the in-kernel add."""
    hg = jnp.dot(globals_pad.astype(jnp.bfloat16), disc["w1_glob"],
                 preferred_element_type=jnp.float32) + disc["b1"]
    return hg.astype(jnp.bfloat16)                        # (b, H1)


def run_pair_disc(rows, hg, p):
    """out[r, j] for all rows r and all b globals j, without materializing the
    (rows*b, feat) concatenated discriminator input."""
    n, f = rows.shape
    b, h1d = hg.shape
    h2d = p["w2"].shape[1]
    tile_r, n_pad = _tile_rows(n, _pair_row_target(b, h1d, h2d))
    if n_pad != n:
        rows = jnp.pad(rows, ((0, n_pad - n), (0, 0)))
    out = pl.pallas_call(
        pair_mlp_kernel,
        out_shape=jax.ShapeDtypeStruct((n_pad, b), jnp.float32),
        grid=(n_pad // tile_r,),
        in_specs=[
            pl.BlockSpec((tile_r, f), lambda i: (i, 0)),
            pl.BlockSpec((b, h1d), lambda i: (0, 0)),
            pl.BlockSpec((f, h1d), lambda i: (0, 0)),
            pl.BlockSpec((h1d, h2d), lambda i: (0, 0)),
            pl.BlockSpec((1, h2d), lambda i: (0, 0)),
            pl.BlockSpec((h2d, 1), lambda i: (0, 0)),
        ],
        out_specs=pl.BlockSpec((tile_r, b), lambda i: (i, 0)),
        compiler_params=pltpu.CompilerParams(
            dimension_semantics=("parallel",),
            vmem_limit_bytes=VMEM_LIMIT),
    )(rows, hg, p["w1_loc"], p["w2"], p["b2"], p["w3"])
    return out[:n] if n_pad != n else out


# ---------------------------------------------------------------------------
# Deterministic parameter init (synthetic weights, no checkpoint) + prepare
# ---------------------------------------------------------------------------

def _linear_init(key, d_in, d_out):
    kw, kb = jax.random.split(key)
    scale = 1.0 / jnp.sqrt(jnp.float32(d_in))
    w = jax.random.uniform(kw, (d_in, d_out), jnp.float32, -scale, scale)
    b = jax.random.uniform(kb, (1, d_out), jnp.float32, -scale, scale)
    return w, b


def init_dim_params(key, d_in, l_dim, g_dim, max_t, hidden):
    k_enc_l, k_enc_g, k_gd, k_ld = jax.random.split(key, 4)
    wl, bl = _linear_init(k_enc_l, d_in, l_dim)
    wg, bg = _linear_init(k_enc_g, l_dim, g_dim)

    def init_disc(k, in_size):
        k1, k2, k3 = jax.random.split(k, 3)
        w1, b1 = _linear_init(k1, in_size, hidden[0])
        w2, b2 = _linear_init(k2, hidden[0], hidden[1])
        w3, b3 = _linear_init(k3, hidden[1], 1)
        return dict(w1=w1, b1=b1, w2=w2, b2=b2, w3=w3, b3=b3)

    return dict(
        encoder=dict(wl=wl, bl=bl, wg=wg, bg=bg),
        global_discr=init_disc(k_gd, max_t * l_dim + g_dim),
        local_discr=init_disc(k_ld, g_dim + l_dim),
    )


def prepare_encoder_params(raw, pad_to=LANE_PAD):
    wl, bl, wg, bg = raw["wl"], raw["bl"], raw["wg"], raw["bg"]
    l_dim, g_dim = wl.shape[1], wg.shape[1]
    lp, gp = _round_up(l_dim, pad_to), _round_up(g_dim, pad_to)
    return dict(
        wl=jnp.pad(wl, ((0, 0), (0, lp - l_dim))).astype(jnp.bfloat16),
        bl=jnp.pad(bl, ((0, 0), (0, lp - l_dim))),
        wg=jnp.pad(wg, ((0, lp - l_dim), (0, gp - g_dim))).astype(jnp.bfloat16),
        bg=jnp.pad(bg, ((0, 0), (0, gp - g_dim))),
    )


def prepare_disc_params(raw, l_dim, g_dim, n_chunks, lp, gp, pad_to=LANE_PAD,
                        cdt=jnp.bfloat16):
    """Exact re-layout of a Discriminator for pair_mlp_kernel:
      * w1 split at n_chunks*l_dim into local / global parts; local rows are
        re-padded per chunk so they line up with the lane-padded features.
      * hidden dims zero-padded; one spare H2 slot carries b3
        (b2 slot = 1 -> ReLU -> 1, matching w3 slot = b3).
      * bf16 weights (f32 accumulation in-kernel); biases stay f32."""
    w1, b1, w2, b2, w3, b3 = (raw["w1"], raw["b1"], raw["w2"], raw["b2"],
                              raw["w3"], raw["b3"])
    h1t, h2t = w1.shape[1], w2.shape[1]
    H1 = _round_up(h1t, pad_to)
    H2 = _round_up(h2t + 1, pad_to)              # +1: guaranteed spare slot
    split = n_chunks * l_dim
    w1l = w1[:split].reshape(n_chunks, l_dim, h1t)
    w1l = jnp.pad(w1l, ((0, 0), (0, lp - l_dim), (0, H1 - h1t)))
    w1l = w1l.reshape(n_chunks * lp, H1).astype(cdt)
    w1g = jnp.pad(w1[split:], ((0, gp - g_dim), (0, H1 - h1t))).astype(cdt)
    b1p = jnp.pad(b1, ((0, 0), (0, H1 - h1t)))                    # (1,H1) f32
    w2p = jnp.pad(w2, ((0, H1 - h1t), (0, H2 - h2t))).astype(cdt)  # (H1,H2)
    b2p = jnp.pad(b2, ((0, 0), (0, H2 - h2t)))                     # (1,H2) f32
    b2p = b2p.at[0, h2t].set(1.0)              # bias slot: ReLU -> exactly 1
    w3p = jnp.pad(w3, ((0, H2 - h2t), (0, 0)))                     # (H2,1)
    w3p = w3p.at[h2t, 0].set(b3[0, 0]).astype(cdt)                 # slot = b3
    return dict(w1_loc=w1l, w1_glob=w1g, b1=b1p, w2=w2p, b2=b2p, w3=w3p)


def prepare_dim_params(raw, max_t, l_dim, g_dim, pad_to=LANE_PAD):
    lp, gp = _round_up(l_dim, pad_to), _round_up(g_dim, pad_to)
    return dict(
        encoder=prepare_encoder_params(raw["encoder"], pad_to),
        global_discr=prepare_disc_params(raw["global_discr"], l_dim, g_dim,
                                         max_t, lp, gp, pad_to),
        local_discr=prepare_disc_params(raw["local_discr"], l_dim, g_dim,
                                        1, lp, gp, pad_to),
    )


# ---------------------------------------------------------------------------
# DIM forward (glue in plain JAX, hot paths in Pallas)
# ---------------------------------------------------------------------------

def dim_forward(params, x, sample_key, *, max_t, l_dim, g_dim):
    b, t, _ = x.shape
    loc_pad, glob_pad = run_encoder(x, params["encoder"])   # (b,t,Lp), (b,Gp)
    lp = loc_pad.shape[-1]
    globals_ = glob_pad[:, :g_dim]
    locals_ = loc_pad[:, :, :l_dim]

    # idx_t = torch.randint(0, t, (b, max_t)).sort(dim=1)[0]; the flat-offset
    # arange is absorbed by the per-batch take_along_axis gather.
    idx_t = jnp.sort(jax.random.randint(sample_key, (b, max_t), 0, t), axis=1)
    ls_rows = jnp.take_along_axis(
        loc_pad, idx_t[:, :, None], axis=1).reshape(b, max_t * lp)
    ls_rows = ls_rows.astype(jnp.bfloat16)

    gd = params["global_discr"]
    globals_mi = run_pair_disc(ls_rows, _h_glob(glob_pad, gd), gd)   # (b, b)

    ld = params["local_discr"]
    # rows ordered (k, i) so the (t*b, b) kernel output is already the final
    # (t, b, b) local-MI tensor (no post-kernel transpose over the big output).
    loc_rows = jnp.transpose(loc_pad, (1, 0, 2)).reshape(t * b, lp)
    loc_rows = loc_rows.astype(jnp.bfloat16)
    locals_mi = run_pair_disc(loc_rows, _h_glob(glob_pad, ld),
                              ld).reshape(t, b, b)

    return globals_, locals_, globals_mi, locals_mi


# ---------------------------------------------------------------------------
# Pure-JAX f32 reference of the torch forward (explicit repeat/concat) for a
# numerical cross-check of the decomposition / padding / bf16.
# ---------------------------------------------------------------------------

def dim_forward_ref(raw, x, sample_key, max_t):
    enc = raw["encoder"]
    loc = jnp.tanh(jnp.einsum("btd,dl->btl", x, enc["wl"]) + enc["bl"])
    glob = jnp.tanh(jnp.mean(loc, axis=1) @ enc["wg"] + enc["bg"])
    b, t, l_dim = loc.shape
    g_dim = glob.shape[-1]
    idx_t = jnp.sort(jax.random.randint(sample_key, (b, max_t), 0, t), axis=1)
    ls = jnp.take_along_axis(loc, idx_t[:, :, None],
                             axis=1).reshape(b, max_t * l_dim)

    def disc(p, z):
        h = jnp.maximum(z @ p["w1"] + p["b1"], 0.0)
        h = jnp.maximum(h @ p["w2"] + p["b2"], 0.0)
        return (h @ p["w3"] + p["b3"])[..., 0]

    g_in = jnp.concatenate(
        [jnp.repeat(ls, b, axis=0), jnp.tile(glob, (b, 1))], axis=-1)
    gmi = disc(raw["global_discr"], g_in).reshape(b, b)
    loc_l = jnp.repeat(loc, b, axis=0)
    glob_l = jnp.broadcast_to(jnp.tile(glob, (b, 1))[:, None, :],
                              (b * b, t, g_dim))
    l_in = jnp.concatenate([loc_l, glob_l], axis=-1).reshape(
        b * b * t, l_dim + g_dim)
    lmi = disc(raw["local_discr"], l_in).reshape(b * b, t).T.reshape(t, b, b)
    return glob, loc, gmi, lmi


# ---------------------------------------------------------------------------

if __name__ == "__main__":
    B, T, D_IN = 4, 8, 16
    L_DIM, G_DIM, MAX_T = 16, 32, 5
    HIDDEN = (32, 32)   # hidden_sizes for both discriminators

    root = jax.random.PRNGKey(0)
    k_param, k_x, k_sample = jax.random.split(root, 3)
    raw_params = init_dim_params(k_param, D_IN, L_DIM, G_DIM, MAX_T, HIDDEN)
    params = prepare_dim_params(raw_params, MAX_T, L_DIM, G_DIM)
    x = jax.random.normal(k_x, (B, T, D_IN), jnp.float32)

    fwd = jax.jit(functools.partial(dim_forward, max_t=MAX_T,
                                    l_dim=L_DIM, g_dim=G_DIM))
    g, l, gmi, lmi = jax.block_until_ready(fwd(params, x, k_sample))

    assert g.shape == (B, G_DIM)
    assert l.shape == (B, T, L_DIM)
    assert gmi.shape == (B, B)
    assert lmi.shape == (T, B, B)

    # Cross-check the decomposed / padded / bf16 kernels against a plain-JAX
    # f32 mirror of the torch forward (loose atol absorbs bf16 matmuls).
    g_r, l_r, gmi_r, lmi_r = dim_forward_ref(raw_params, x, k_sample, MAX_T)
    np.testing.assert_allclose(np.asarray(g), np.asarray(g_r), atol=2e-2, rtol=0)
    np.testing.assert_allclose(np.asarray(l), np.asarray(l_r), atol=2e-2, rtol=0)
    np.testing.assert_allclose(np.asarray(gmi), np.asarray(gmi_r), atol=5e-2, rtol=0)
    np.testing.assert_allclose(np.asarray(lmi), np.asarray(lmi_r), atol=5e-2, rtol=0)

    print("KERNEL_OK")
</pallas_src>

<mosaic_0001>
module attributes {stable_mosaic.version = 11 : i64} {
  func.func @encoder_kernel(%arg0: i32, %arg1: memref<4x8x16xf32, #tpu.memory_space<vmem>>, %arg2: memref<16x128xbf16, #tpu.memory_space<vmem>>, %arg3: memref<1x128xf32, #tpu.memory_space<vmem>>, %arg4: memref<128x128xbf16, #tpu.memory_space<vmem>>, %arg5: memref<1x128xf32, #tpu.memory_space<vmem>>, %arg6: memref<4x8x128xf32, #tpu.memory_space<vmem>>, %arg7: memref<4x128xf32, #tpu.memory_space<vmem>>) attributes {dimension_semantics = [#tpu.dimension_semantics<parallel>], iteration_bounds = array<i64: 1>, scalar_prefetch = 0 : i64, scratch_operands = 0 : i64, tpu.core_type = #tpu.core_type<tc>, window_params = [{transform_indices = @transform_0, window_bounds = array<i64: 4, 8, 16>}, {pipeline_mode = #tpu.pipeline_mode<synchronous>, transform_indices = @transform_1, window_bounds = array<i64: 16, 128>}, {pipeline_mode = #tpu.pipeline_mode<synchronous>, transform_indices = @transform_2, window_bounds = array<i64: 1, 128>}, {pipeline_mode = #tpu.pipeline_mode<synchronous>, transform_indices = @transform_3, window_bounds = array<i64: 128, 128>}, {pipeline_mode = #tpu.pipeline_mode<synchronous>, transform_indices = @transform_4, window_bounds = array<i64: 1, 128>}, {transform_indices = @transform_5, window_bounds = array<i64: 4, 8, 128>}, {transform_indices = @transform_6, window_bounds = array<i64: 4, 128>}]} {
    %c0 = arith.constant 0 : index
    %c0_0 = arith.constant 0 : index
    %c0_1 = arith.constant 0 : index
    %0 = vector.load %arg1[%c0, %c0_0, %c0_1] : memref<4x8x16xf32, #tpu.memory_space<vmem>>, vector<4x8x16xf32>
    %1 = vector.shape_cast %0 : vector<4x8x16xf32> to vector<32x16xf32>
    %2 = arith.truncf %1 : vector<32x16xf32> to vector<32x16xbf16>
    %c0_2 = arith.constant 0 : index
    %c0_3 = arith.constant 0 : index
    %3 = vector.load %arg2[%c0_2, %c0_3] : memref<16x128xbf16, #tpu.memory_space<vmem>>, vector<16x128xbf16>
    %cst = arith.constant dense<0.000000e+00> : vector<32x128xf32>
    %4 = tpu.matmul %2, %3, %cst {dimension_numbers = #tpu.dot_dimension_numbers<[1], [0], [0], [1], [0, 0, 1, 1], [], []>} : vector<32x16xbf16>, vector<16x128xbf16>, vector<32x128xf32> -> vector<32x128xf32>
    %c0_4 = arith.constant 0 : index
    %c0_5 = arith.constant 0 : index
    %5 = vector.load %arg3[%c0_4, %c0_5] : memref<1x128xf32, #tpu.memory_space<vmem>>, vector<1x128xf32>
    %6 = vector.broadcast %5 : vector<1x128xf32> to vector<32x128xf32>
    %7 = arith.addf %4, %6 : vector<32x128xf32>
    %8 = math.tanh %7 : vector<32x128xf32>
    %9 = vector.shape_cast %8 : vector<32x128xf32> to vector<4x8x128xf32>
    %c0_6 = arith.constant 0 : index
    %c0_7 = arith.constant 0 : index
    %c0_8 = arith.constant 0 : index
    %10 = vector.load %arg6[%c0_6, %c0_7, %c0_8] : memref<4x8x128xf32, #tpu.memory_space<vmem>>, vector<4x8x128xf32>
    tpu.vector_store %arg6[%c0_6, %c0_7, %c0_8], %9 {strides = array<i32>} : memref<4x8x128xf32, #tpu.memory_space<vmem>>, vector<4x8x128xf32>,
    %cst_9 = arith.constant dense<0.000000e+00> : vector<4x128xf32>
    %11 = vector.multi_reduction <add>, %9, %cst_9 [1] : vector<4x8x128xf32> to vector<4x128xf32>
    %cst_10 = arith.constant 8.000000e+00 : f32
    %12 = vector.broadcast %cst_10 : f32 to vector<4x128xf32>
    %13 = arith.divf %11, %12 : vector<4x128xf32>
    %14 = arith.truncf %13 : vector<4x128xf32> to vector<4x128xbf16>
    %c0_11 = arith.constant 0 : index
    %c0_12 = arith.constant 0 : index
    %15 = vector.load %arg4[%c0_11, %c0_12] : memref<128x128xbf16, #tpu.memory_space<vmem>>, vector<128x128xbf16>
    %cst_13 = arith.constant dense<0.000000e+00> : vector<4x128xf32>
    %16 = tpu.matmul %14, %15, %cst_13 {dimension_numbers = #tpu.dot_dimension_numbers<[1], [0], [0], [1], [0, 0, 1, 1], [], []>} : vector<4x128xbf16>, vector<128x128xbf16>, vector<4x128xf32> -> vector<4x128xf32>
    %c0_14 = arith.constant 0 : index
    %c0_15 = arith.constant 0 : index
    %17 = vector.load %arg5[%c0_14, %c0_15] : memref<1x128xf32, #tpu.memory_space<vmem>>, vector<1x128xf32>
    %18 = vector.broadcast %17 : vector<1x128xf32> to vector<4x128xf32>
    %19 = arith.addf %16, %18 : vector<4x128xf32>
    %20 = math.tanh %19 : vector<4x128xf32>
    %c0_16 = arith.constant 0 : index
    %c0_17 = arith.constant 0 : index
    %21 = vector.load %arg7[%c0_16, %c0_17] : memref<4x128xf32, #tpu.memory_space<vmem>>, vector<4x128xf32>
    tpu.vector_store %arg7[%c0_16, %c0_17], %20 {strides = array<i32>} : memref<4x128xf32, #tpu.memory_space<vmem>>, vector<4x128xf32>,
    return
  }
  func.func @transform_0(%arg0: i32) -> (i32, i32, i32) {
    %c0_i32 = arith.constant 0 : i32
    %c0_i32_0 = arith.constant 0 : i32
    %c0_i32_1 = arith.constant 0 : i32
    return %arg0, %c0_i32, %c0_i32_0 : i32, i32, i32
  }
  func.func @transform_1(%arg0: i32) -> (i32, i32) {
    %c0_i32 = arith.constant 0 : i32
    %c0_i32_0 = arith.constant 0 : i32
    %c0_i32_1 = arith.constant 0 : i32
    return %c0_i32, %c0_i32_0 : i32, i32
  }
  func.func @transform_2(%arg0: i32) -> (i32, i32) {
    %c0_i32 = arith.constant 0 : i32
    %c0_i32_0 = arith.constant 0 : i32
    %c0_i32_1 = arith.constant 0 : i32
    return %c0_i32, %c0_i32_0 : i32, i32
  }
  func.func @transform_3(%arg0: i32) -> (i32, i32) {
    %c0_i32 = arith.constant 0 : i32
    %c0_i32_0 = arith.constant 0 : i32
    %c0_i32_1 = arith.constant 0 : i32
    return %c0_i32, %c0_i32_0 : i32, i32
  }
  func.func @transform_4(%arg0: i32) -> (i32, i32) {
    %c0_i32 = arith.constant 0 : i32
    %c0_i32_0 = arith.constant 0 : i32
    %c0_i32_1 = arith.constant 0 : i32
    return %c0_i32, %c0_i32_0 : i32, i32
  }
  func.func @transform_5(%arg0: i32) -> (i32, i32, i32) {
    %c0_i32 = arith.constant 0 : i32
    %c0_i32_0 = arith.constant 0 : i32
    %c0_i32_1 = arith.constant 0 : i32
    return %arg0, %c0_i32, %c0_i32_0 : i32, i32, i32
  }
  func.func @transform_6(%arg0: i32) -> (i32, i32) {
    %c0_i32 = arith.constant 0 : i32
    %c0_i32_0 = arith.constant 0 : i32
    return %arg0, %c0_i32 : i32, i32
  }
}

module attributes {stable_mosaic.version = 11 : i64} {
  func.func @pair_mlp_kernel(%arg0: i32, %arg1: memref<4x640xbf16, #tpu.memory_space<vmem>>, %arg2: memref<4x128xbf16, #tpu.memory_space<vmem>>, %arg3: memref<640x128xbf16, #tpu.memory_space<vmem>>, %arg4: memref<128x128xbf16, #tpu.memory_space<vmem>>, %arg5: memref<1x128xf32, #tpu.memory_space<vmem>>, %arg6: memref<128x1xbf16, #tpu.memory_space<vmem>>, %arg7: memref<4x4xf32, #tpu.memory_space<vmem>>) attributes {dimension_semantics = [#tpu.dimension_semantics<parallel>], iteration_bounds = array<i64: 1>, scalar_prefetch = 0 : i64, scratch_operands = 0 : i64, tpu.core_type = #tpu.core_type<tc>, window_params = [{transform_indices = @transform_0, window_bounds = array<i64: 4, 640>}, {pipeline_mode = #tpu.pipeline_mode<synchronous>, transform_indices = @transform_1, window_bounds = array<i64: 4, 128>}, {pipeline_mode = #tpu.pipeline_mode<synchronous>, transform_indices = @transform_2, window_bounds = array<i64: 640, 128>}, {pipeline_mode = #tpu.pipeline_mode<synchronous>, transform_indices = @transform_3, window_bounds = array<i64: 128, 128>}, {pipeline_mode = #tpu.pipeline_mode<synchronous>, transform_indices = @transform_4, window_bounds = array<i64: 1, 128>}, {pipeline_mode = #tpu.pipeline_mode<synchronous>, transform_indices = @transform_5, window_bounds = array<i64: 128, 1>}, {transform_indices = @transform_6, window_bounds = array<i64: 4, 4>}]} {
    %c0 = arith.constant 0 : index
    %c0_0 = arith.constant 0 : index
    %0 = vector.load %arg1[%c0, %c0_0] : memref<4x640xbf16, #tpu.memory_space<vmem>>, vector<4x640xbf16>
    %c0_1 = arith.constant 0 : index
    %c0_2 = arith.constant 0 : index
    %1 = vector.load %arg3[%c0_1, %c0_2] : memref<640x128xbf16, #tpu.memory_space<vmem>>, vector<640x128xbf16>
    %cst = arith.constant dense<0.000000e+00> : vector<4x128xf32>
    %2 = tpu.matmul %0, %1, %cst {dimension_numbers = #tpu.dot_dimension_numbers<[1], [0], [0], [1], [0, 0, 1, 1], [], []>} : vector<4x640xbf16>, vector<640x128xbf16>, vector<4x128xf32> -> vector<4x128xf32>
    %3 = arith.truncf %2 : vector<4x128xf32> to vector<4x128xbf16>
    %4 = vector.shape_cast %3 : vector<4x128xbf16> to vector<4x1x128xbf16>
    %c0_3 = arith.constant 0 : index
    %c0_4 = arith.constant 0 : index
    %5 = vector.load %arg2[%c0_3, %c0_4] : memref<4x128xbf16, #tpu.memory_space<vmem>>, vector<4x128xbf16>
    %6 = vector.shape_cast %5 : vector<4x128xbf16> to vector<1x4x128xbf16>
    %7 = vector.broadcast %4 : vector<4x1x128xbf16> to vector<4x4x128xbf16>
    %8 = vector.broadcast %6 : vector<1x4x128xbf16> to vector<4x4x128xbf16>
    %9 = arith.addf %7, %8 : vector<4x4x128xbf16>
    %cst_5 = arith.constant 0.000000e+00 : bf16
    %10 = vector.broadcast %cst_5 : bf16 to vector<4x4x128xbf16>
    %11 = arith.maximumf %9, %10 : vector<4x4x128xbf16>
    %12 = vector.shape_cast %11 : vector<4x4x128xbf16> to vector<16x128xbf16>
    %c0_6 = arith.constant 0 : index
    %c0_7 = arith.constant 0 : index
    %13 = vector.load %arg4[%c0_6, %c0_7] : memref<128x128xbf16, #tpu.memory_space<vmem>>, vector<128x128xbf16>
    %cst_8 = arith.constant dense<0.000000e+00> : vector<16x128xf32>
    %14 = tpu.matmul %12, %13, %cst_8 {dimension_numbers = #tpu.dot_dimension_numbers<[1], [0], [0], [1], [0, 0, 1, 1], [], []>} : vector<16x128xbf16>, vector<128x128xbf16>, vector<16x128xf32> -> vector<16x128xf32>
    %c0_9 = arith.constant 0 : index
    %c0_10 = arith.constant 0 : index
    %15 = vector.load %arg5[%c0_9, %c0_10] : memref<1x128xf32, #tpu.memory_space<vmem>>, vector<1x128xf32>
    %16 = vector.broadcast %15 : vector<1x128xf32> to vector<16x128xf32>
    %17 = arith.addf %14, %16 : vector<16x128xf32>
    %cst_11 = arith.constant 0.000000e+00 : f32
    %18 = vector.broadcast %cst_11 : f32 to vector<16x128xf32>
    %19 = arith.maximumf %17, %18 : vector<16x128xf32>
    %20 = arith.truncf %19 : vector<16x128xf32> to vector<16x128xbf16>
    %c0_12 = arith.constant 0 : index
    %c0_13 = arith.constant 0 : index
    %21 = vector.load %arg6[%c0_12, %c0_13] : memref<128x1xbf16, #tpu.memory_space<vmem>>, vector<128x1xbf16>
    %cst_14 = arith.constant dense<0.000000e+00> : vector<16x1xf32>
    %22 = tpu.matmul %20, %21, %cst_14 {dimension_numbers = #tpu.dot_dimension_numbers<[1], [0], [0], [1], [0, 0, 1, 1], [], []>} : vector<16x128xbf16>, vector<128x1xbf16>, vector<16x1xf32> -> vector<16x1xf32>
    %23 = vector.shape_cast %22 : vector<16x1xf32> to vector<16x1xf32>
    %24 = vector.broadcast %23 : vector<16x1xf32> to vector<16x4xf32>
    %25 = vector.shape_cast %24 : vector<16x4xf32> to vector<4x4x4xf32>
    %26 = tpu.iota {dimensions = array<i32: 0>} : vector<4x4xi32>
    %27 = tpu.iota {dimensions = array<i32: 1>} : vector<4x4xi32>
    %28 = arith.cmpi eq, %26, %27 : vector<4x4xi32>
    %29 = vector.shape_cast %28 : vector<4x4xi1> to vector<1x4x4xi1>
    %cst_15 = arith.constant 0.000000e+00 : f32
    %30 = vector.shape_cast %29 : vector<1x4x4xi1> to vector<1x4x4xi1>
    %31 = vector.broadcast %30 : vector<1x4x4xi1> to vector<4x4x4xi1>
    %32 = vector.broadcast %cst_15 : f32 to vector<4x4x4xf32>
    %33 = arith.select %31, %25, %32 : vector<4x4x4xi1>, vector<4x4x4xf32>
    %cst_16 = arith.constant dense<0.000000e+00> : vector<4x4xf32>
    %34 = vector.multi_reduction <add>, %33, %cst_16 [1] : vector<4x4x4xf32> to vector<4x4xf32>
    %c0_17 = arith.constant 0 : index
    %c0_18 = arith.constant 0 : index
    %35 = vector.load %arg7[%c0_17, %c0_18] : memref<4x4xf32, #tpu.memory_space<vmem>>, vector<4x4xf32>
    tpu.vector_store %arg7[%c0_17, %c0_18], %34 {strides = array<i32>} : memref<4x4xf32, #tpu.memory_space<vmem>>, vector<4x4xf32>,
    return
  }
  func.func @transform_0(%arg0: i32) -> (i32, i32) {
    %c0_i32 = arith.constant 0 : i32
    %c0_i32_0 = arith.constant 0 : i32
    return %arg0, %c0_i32 : i32, i32
  }
  func.func @transform_1(%arg0: i32) -> (i32, i32) {
    %c0_i32 = arith.constant 0 : i32
    %c0_i32_0 = arith.constant 0 : i32
    %c0_i32_1 = arith.constant 0 : i32
    return %c0_i32, %c0_i32_0 : i32, i32
  }
  func.func @transform_2(%arg0: i32) -> (i32, i32) {
    %c0_i32 = arith.constant 0 : i32
    %c0_i32_0 = arith.constant 0 : i32
    %c0_i32_1 = arith.constant 0 : i32
    return %c0_i32, %c0_i32_0 : i32, i32
  }
  func.func @transform_3(%arg0: i32) -> (i32, i32) {
    %c0_i32 = arith.constant 0 : i32
    %c0_i32_0 = arith.constant 0 : i32
    %c0_i32_1 = arith.constant 0 : i32
    return %c0_i32, %c0_i32_0 : i32, i32
  }
  func.func @transform_4(%arg0: i32) -> (i32, i32) {
    %c0_i32 = arith.constant 0 : i32
    %c0_i32_0 = arith.constant 0 : i32
    %c0_i32_1 = arith.constant 0 : i32
    return %c0_i32, %c0_i32_0 : i32, i32
  }
  func.func @transform_5(%arg0: i32) -> (i32, i32) {
    %c0_i32 = arith.constant 0 : i32
    %c0_i32_0 = arith.constant 0 : i32
    %c0_i32_1 = arith.constant 0 : i32
    return %c0_i32, %c0_i32_0 : i32, i32
  }
  func.func @transform_6(%arg0: i32) -> (i32, i32) {
    %c0_i32 = arith.constant 0 : i32
    %c0_i32_0 = arith.constant 0 : i32
    return %arg0, %c0_i32 : i32, i32
  }
}

module attributes {stable_mosaic.version = 11 : i64} {
  func.func @pair_mlp_kernel(%arg0: i32, %arg1: memref<16x128xbf16, #tpu.memory_space<vmem>>, %arg2: memref<4x128xbf16, #tpu.memory_space<vmem>>, %arg3: memref<128x128xbf16, #tpu.memory_space<vmem>>, %arg4: memref<128x128xbf16, #tpu.memory_space<vmem>>, %arg5: memref<1x128xf32, #tpu.memory_space<vmem>>, %arg6: memref<128x1xbf16, #tpu.memory_space<vmem>>, %arg7: memref<16x4xf32, #tpu.memory_space<vmem>>) attributes {dimension_semantics = [#tpu.dimension_semantics<parallel>], iteration_bounds = array<i64: 2>, scalar_prefetch = 0 : i64, scratch_operands = 0 : i64, tpu.core_type = #tpu.core_type<tc>, window_params = [{transform_indices = @transform_0, window_bounds = array<i64: 16, 128>}, {pipeline_mode = #tpu.pipeline_mode<synchronous>, transform_indices = @transform_1, window_bounds = array<i64: 4, 128>}, {pipeline_mode = #tpu.pipeline_mode<synchronous>, transform_indices = @transform_2, window_bounds = array<i64: 128, 128>}, {pipeline_mode = #tpu.pipeline_mode<synchronous>, transform_indices = @transform_3, window_bounds = array<i64: 128, 128>}, {pipeline_mode = #tpu.pipeline_mode<synchronous>, transform_indices = @transform_4, window_bounds = array<i64: 1, 128>}, {pipeline_mode = #tpu.pipeline_mode<synchronous>, transform_indices = @transform_5, window_bounds = array<i64: 128, 1>}, {transform_indices = @transform_6, window_bounds = array<i64: 16, 4>}]} {
    %c0 = arith.constant 0 : index
    %c0_0 = arith.constant 0 : index
    %0 = vector.load %arg1[%c0, %c0_0] : memref<16x128xbf16, #tpu.memory_space<vmem>>, vector<16x128xbf16>
    %c0_1 = arith.constant 0 : index
    %c0_2 = arith.constant 0 : index
    %1 = vector.load %arg3[%c0_1, %c0_2] : memref<128x128xbf16, #tpu.memory_space<vmem>>, vector<128x128xbf16>
    %cst = arith.constant dense<0.000000e+00> : vector<16x128xf32>
    %2 = tpu.matmul %0, %1, %cst {dimension_numbers = #tpu.dot_dimension_numbers<[1], [0], [0], [1], [0, 0, 1, 1], [], []>} : vector<16x128xbf16>, vector<128x128xbf16>, vector<16x128xf32> -> vector<16x128xf32>
    %3 = arith.truncf %2 : vector<16x128xf32> to vector<16x128xbf16>
    %4 = vector.shape_cast %3 : vector<16x128xbf16> to vector<16x1x128xbf16>
    %c0_3 = arith.constant 0 : index
    %c0_4 = arith.constant 0 : index
    %5 = vector.load %arg2[%c0_3, %c0_4] : memref<4x128xbf16, #tpu.memory_space<vmem>>, vector<4x128xbf16>
    %6 = vector.shape_cast %5 : vector<4x128xbf16> to vector<1x4x128xbf16>
    %7 = vector.broadcast %4 : vector<16x1x128xbf16> to vector<16x4x128xbf16>
    %8 = vector.broadcast %6 : vector<1x4x128xbf16> to vector<16x4x128xbf16>
    %9 = arith.addf %7, %8 : vector<16x4x128xbf16>
    %cst_5 = arith.constant 0.000000e+00 : bf16
    %10 = vector.broadcast %cst_5 : bf16 to vector<16x4x128xbf16>
    %11 = arith.maximumf %9, %10 : vector<16x4x128xbf16>
    %12 = vector.shape_cast %11 : vector<16x4x128xbf16> to vector<64x128xbf16>
    %c0_6 = arith.constant 0 : index
    %c0_7 = arith.constant 0 : index
    %13 = vector.load %arg4[%c0_6, %c0_7] : memref<128x128xbf16, #tpu.memory_space<vmem>>, vector<128x128xbf16>
    %cst_8 = arith.constant dense<0.000000e+00> : vector<64x128xf32>
    %14 = tpu.matmul %12, %13, %cst_8 {dimension_numbers = #tpu.dot_dimension_numbers<[1], [0], [0], [1], [0, 0, 1, 1], [], []>} : vector<64x128xbf16>, vector<128x128xbf16>, vector<64x128xf32> -> vector<64x128xf32>
    %c0_9 = arith.constant 0 : index
    %c0_10 = arith.constant 0 : index
    %15 = vector.load %arg5[%c0_9, %c0_10] : memref<1x128xf32, #tpu.memory_space<vmem>>, vector<1x128xf32>
    %16 = vector.broadcast %15 : vector<1x128xf32> to vector<64x128xf32>
    %17 = arith.addf %14, %16 : vector<64x128xf32>
    %cst_11 = arith.constant 0.000000e+00 : f32
    %18 = vector.broadcast %cst_11 : f32 to vector<64x128xf32>
    %19 = arith.maximumf %17, %18 : vector<64x128xf32>
    %20 = arith.truncf %19 : vector<64x128xf32> to vector<64x128xbf16>
    %c0_12 = arith.constant 0 : index
    %c0_13 = arith.constant 0 : index
    %21 = vector.load %arg6[%c0_12, %c0_13] : memref<128x1xbf16, #tpu.memory_space<vmem>>, vector<128x1xbf16>
    %cst_14 = arith.constant dense<0.000000e+00> : vector<64x1xf32>
    %22 = tpu.matmul %20, %21, %cst_14 {dimension_numbers = #tpu.dot_dimension_numbers<[1], [0], [0], [1], [0, 0, 1, 1], [], []>} : vector<64x128xbf16>, vector<128x1xbf16>, vector<64x1xf32> -> vector<64x1xf32>
    %23 = vector.shape_cast %22 : vector<64x1xf32> to vector<64x1xf32>
    %24 = vector.broadcast %23 : vector<64x1xf32> to vector<64x4xf32>
    %25 = vector.shape_cast %24 : vector<64x4xf32> to vector<16x4x4xf32>
    %26 = tpu.iota {dimensions = array<i32: 0>} : vector<4x4xi32>
    %27 = tpu.iota {dimensions = array<i32: 1>} : vector<4x4xi32>
    %28 = arith.cmpi eq, %26, %27 : vector<4x4xi32>
    %29 = vector.shape_cast %28 : vector<4x4xi1> to vector<1x4x4xi1>
    %cst_15 = arith.constant 0.000000e+00 : f32
    %30 = vector.shape_cast %29 : vector<1x4x4xi1> to vector<1x4x4xi1>
    %31 = vector.broadcast %30 : vector<1x4x4xi1> to vector<16x4x4xi1>
    %32 = vector.broadcast %cst_15 : f32 to vector<16x4x4xf32>
    %33 = arith.select %31, %25, %32 : vector<16x4x4xi1>, vector<16x4x4xf32>
    %cst_16 = arith.constant dense<0.000000e+00> : vector<16x4xf32>
    %34 = vector.multi_reduction <add>, %33, %cst_16 [1] : vector<16x4x4xf32> to vector<16x4xf32>
    %c0_17 = arith.constant 0 : index
    %c0_18 = arith.constant 0 : index
    %35 = vector.load %arg7[%c0_17, %c0_18] : memref<16x4xf32, #tpu.memory_space<vmem>>, vector<16x4xf32>
    tpu.vector_store %arg7[%c0_17, %c0_18], %34 {strides = array<i32>} : memref<16x4xf32, #tpu.memory_space<vmem>>, vector<16x4xf32>,
    return
  }
  func.func @transform_0(%arg0: i32) -> (i32, i32) {
    %c0_i32 = arith.constant 0 : i32
    %c0_i32_0 = arith.constant 0 : i32
    return %arg0, %c0_i32 : i32, i32
  }
  func.func @transform_1(%arg0: i32) -> (i32, i32) {
    %c0_i32 = arith.constant 0 : i32
    %c0_i32_0 = arith.constant 0 : i32
    %c0_i32_1 = arith.constant 0 : i32
    return %c0_i32, %c0_i32_0 : i32, i32
  }
  func.func @transform_2(%arg0: i32) -> (i32, i32) {
    %c0_i32 = arith.constant 0 : i32
    %c0_i32_0 = arith.constant 0 : i32
    %c0_i32_1 = arith.constant 0 : i32
    return %c0_i32, %c0_i32_0 : i32, i32
  }
  func.func @transform_3(%arg0: i32) -> (i32, i32) {
    %c0_i32 = arith.constant 0 : i32
    %c0_i32_0 = arith.constant 0 : i32
    %c0_i32_1 = arith.constant 0 : i32
    return %c0_i32, %c0_i32_0 : i32, i32
  }
  func.func @transform_4(%arg0: i32) -> (i32, i32) {
    %c0_i32 = arith.constant 0 : i32
    %c0_i32_0 = arith.constant 0 : i32
    %c0_i32_1 = arith.constant 0 : i32
    return %c0_i32, %c0_i32_0 : i32, i32
  }
  func.func @transform_5(%arg0: i32) -> (i32, i32) {
    %c0_i32 = arith.constant 0 : i32
    %c0_i32_0 = arith.constant 0 : i32
    %c0_i32_1 = arith.constant 0 : i32
    return %c0_i32, %c0_i32_0 : i32, i32
  }
  func.func @transform_6(%arg0: i32) -> (i32, i32) {
    %c0_i32 = arith.constant 0 : i32
    %c0_i32_0 = arith.constant 0 : i32
    return %arg0, %c0_i32 : i32, i32
  }
}

</mosaic_0001>

<bundles_post_ra>
// kernel: dim_forward.3
= control target key start
LH: loop header
LB: loop body
LE: loop exit
PB: predicated region body
PF: predicated region fallthrough
CT: control target
= control target key end

     0   :  { %vm44_vm0 = vcmask 130048   ;;  %v350_v8 = vmov 0.0   ;;  %vm351_vm1 = vmmov 0   ;;  %vm172_vm2 = vcmask 1041409   ;;  %s447_s1 = inlined_call_operand.vmem [shape: bf16[16,128], index: 1, kind: input, shape index: {}]   ;;  %s448_s0 = inlined_call_operand.vmem [shape: f32[4,8,16], index: 0, kind: input, shape index: {}]   ;;  %s449_s3 = inlined_call_operand.vmem [shape: bf16[128,128], index: 3, kind: input, shape index: {}]   ;;  %s450_s2 = inlined_call_operand.vmem [shape: f32[1,128], index: 2, kind: input, shape index: {}]   ;;  %s451_s5 = inlined_call_operand.vmem [shape: f32[4,8,128], index: 5, kind: output, shape index: {0}]   ;;  %s452_s4 = inlined_call_operand.vmem [shape: f32[1,128], index: 4, kind: input, shape index: {}]   ;;  %s453_s6 = inlined_call_operand.vmem [shape: f32[4,128], index: 6, kind: output, shape index: {1}]  }
   0x1   :  { %v331_v0 = vld [vmem:[%s447_s1] sm:$0xff]   ;;  %v24_v2 = vld [vmem:[%s448_s0 + $0x8] sm:$0xff]  ;;  %v25_v3 = vld [vmem:[%s448_s0 + $0x10] sm:$0xff]  ;;  %309 = vmatprep.subr.bf16.mxu1 %v350_v8  ;;  %325 = vmatprep.mubr.msk.bf16.mxu1 %vm351_vm1, %v350_v8  ;;  %vm174_vm3 = vcmask 1042434   ;;  %vm176_vm4 = vcmask 1043459  }
   0x2   :  { %v23_v1 = vld [vmem:[%s448_s0] sm:$0xff]  ;;  %303 = vmatprep.subr.bf16.mxu0 %v331_v0  ;;  %v26_v5 = vld [vmem:[%s448_s0 + $0x18] sm:$0xff]  ;;  %v333_v9 = vld [vmem:[%s449_s3 + $0x30] sm:$0xff]  }
   0x3   :  { %v27_v4 = vpack.c.bf16 %v24_v2, %v23_v1  ;;  %304 = vmatpush3.bf16.msra.mxu0 %v331_v0  ;;  %v28_v6 = vpack.c.bf16 %v26_v5, %v25_v3  ;;  %v332_v7 = vld [vmem:[%s449_s3 + $0x38] sm:$0xff]   ;;  %v334_v10 = vld [vmem:[%s449_s3 + $0x28] sm:$0xff]   ;;  %v335_v11 = vld [vmem:[%s449_s3 + $0x20] sm:$0xff]  }
   0x4   :  { %310 = vmatpush3.bf16.msra.mxu1 %v332_v7  ;;  %v336_v12 = vld [vmem:[%s449_s3 + $0x18] sm:$0xff]   ;;  %v337_v13 = vld [vmem:[%s449_s3 + $0x10] sm:$0xff]   ;;  %v338_v14 = vld [vmem:[%s449_s3 + $0x8] sm:$0xff]  }
   0x5   :  { %305 = vmatprep.mubr.msk.bf16.mxu0 %vm44_vm0, %v27_v4  ;;  %311 = vmatprep.subr.bf16.mxu1 %v350_v8  ;;  %v339_v15 = vld [vmem:[%s449_s3] sm:$0xff]  }
   0x6   :  { %306 = vmatmul.mubr.msk.bf16.vlgmr.msra.gmra.mxu0 %vm44_vm0, %v28_v6  ;;  %v278_v16 = vld [vmem:[%s450_s2] ss:$0 sm:$0xff] }
   0x7   :  { %v282_v5 = vld [vmem:[%s452_s4] ss:$0 sm:$0xff] }
   0x8   :  { %312 = vmatpush3.bf16.msra.mxu1 %v333_v9 }
   0x9   :  { %313 = vmatprep.subr.bf16.mxu1 %v350_v8 }
   0xc   :  { %314 = vmatpush3.bf16.msra.mxu1 %v334_v10 }
   0xd   :  { %315 = vmatprep.subr.bf16.mxu1 %v350_v8 }
  0x10   :  { %316 = vmatpush3.bf16.msra.mxu1 %v335_v11 }
  0x11   :  { %317 = vmatprep.subr.bf16.mxu1 %v350_v8 }
  0x14   :  { %318 = vmatpush3.bf16.msra.mxu1 %v336_v12 }
  0x15   :  { %319 = vmatprep.subr.bf16.mxu1 %v350_v8 }
  0x18   :  { %320 = vmatpush3.bf16.msra.mxu1 %v337_v13 }
  0x19   :  { %321 = vmatprep.subr.bf16.mxu1 %v350_v8 }
  0x1c   :  { %322 = vmatpush3.bf16.msra.mxu1 %v338_v14 }
  0x1d   :  { %323 = vmatprep.subr.bf16.mxu1 %v350_v8 }
  0x20   :  { %324 = vmatpush3.bf16.msra.mxu1 %v339_v15 }
  0xc6   :  { %v307_v17 = vpop.f32.mrf.mxu0 }
  0xc7   :  { %v94_v18 = vadd.f32 %v307_v17, %v278_v16 }
  0xc8   :  { %v85_v19 = vpop.f32.mrf.mxu0 }
  0xc9   :  { %340 = vtanh.f32 %v94_v18  ;;  %v86_v20 = vadd.f32 %v278_v16, %v85_v19 }
  0xca   :  { %v308_v21 = vpop.f32.mrf.mxu0 }
  0xcb   :  { %342 = vtanh.f32 %v86_v20  ;;  %v97_v22 = vadd.f32 %v308_v21, %v278_v16 }
  0xcc   :  { %v88_v23 = vpop.f32.mrf.mxu0 }
  0xcd   :  { %344 = vtanh.f32 %v97_v22  ;;  %v89_v24 = vadd.f32 %v278_v16, %v88_v23 }
  0xcf   :  { %346 = vtanh.f32 %v89_v24 }
  0xd6   :  { %v341_v25 = vpop.eup %340 }
  0xd7   :  { %106 = vst [vmem:[%s451_s5 + $0x10] sm:$0xff] %v341_v25  ;;  %v120_v26 = vrot.slane %v341_v25, 4 }
  0xd8   :  { %v343_v27 = vpop.eup %342 }
  0xd9   :  { %104 = vst [vmem:[%s451_s5] sm:$0xff] %v343_v27  ;;  %v108_v28 = vrot.slane %v343_v27, 4  ;;  %v121_v29 = vadd.f32 %v341_v25, %v120_v26 }
  0xda   :  { %v345_v30 = vpop.eup %344 }
  0xdb   :  { %107 = vst [vmem:[%s451_s5 + $0x18] sm:$0xff] %v345_v30  ;;  %v109_v31 = vadd.f32 %v343_v27, %v108_v28  ;;  %v122_v32 = vrot.slane %v121_v29, 2  ;;  %v126_v33 = vrot.slane %v345_v30, 4 }
  0xdc   :  { %v347_v34 = vpop.eup %346 }
  0xdd   :  { %105 = vst [vmem:[%s451_s5 + $0x8] sm:$0xff] %v347_v34  ;;  %v110_v35 = vrot.slane %v109_v31, 2  ;;  %v114_v36 = vrot.slane %v347_v34, 4  ;;  %v123_v37 = vadd.f32 %v122_v32, %v121_v29  ;;  %v127_v38 = vadd.f32 %v345_v30, %v126_v33 }
  0xdf   :  { %v111_v39 = vadd.f32 %v110_v35, %v109_v31  ;;  %v115_v40 = vadd.f32 %v347_v34, %v114_v36  ;;  %v124_v41 = vrot.slane %v123_v37, 1  ;;  %v128_v42 = vrot.slane %v127_v38, 2 }
  0xe1   :  { %v112_v43 = vrot.slane %v111_v39, 1  ;;  %v116_v44 = vrot.slane %v115_v40, 2  ;;  %v129_v45 = vadd.f32 %v128_v42, %v127_v38  ;;  %v125_v46 = vadd.f32 %v124_v41, %v123_v37 }
  0xe3   :  { %v113_v47 = vadd.f32 %v112_v43, %v111_v39  ;;  %v117_v48 = vadd.f32 %v116_v44, %v115_v40  ;;  %v130_v49 = vrot.slane %v129_v45, 1  ;;  %v135_v53 = vmul.f32 0.125, %v125_v46 }
  0xe5   :  { %v118_v50 = vrot.slane %v117_v48, 1  ;;  %v131_v51 = vadd.f32 %v130_v49, %v129_v45  ;;  %v133_v52 = vmul.f32 0.125, %v113_v47  ;;  %v139_v58 = vpack.c.bf16 %v135_v53, %v135_v53 }
  0xe7   :  { %v119_v54 = vadd.f32 %v118_v50, %v117_v48  ;;  %v136_v55 = vmul.f32 0.125, %v131_v51  ;;  %v137_v57 = vpack.c.bf16 %v133_v52, %v133_v52  ;;  %v170_v63 = vunpack.c.l.b16 %v139_v58 }
  0xe9   :  { %v134_v56 = vmul.f32 0.125, %v119_v54  ;;  %v140_v60 = vpack.c.bf16 %v136_v55, %v136_v55  ;;  %v168_v61 = vunpack.c.l.b16 %v137_v57 }
  0xeb   :  { %v138_v59 = vpack.c.bf16 %v134_v56, %v134_v56  ;;  %v171_v0 = vunpack.c.l.b16 %v140_v60 }
  0xed   :  { %v169_v62 = vunpack.c.l.b16 %v138_v59 }
  0xef   :  { %v173_v1 = vsel %vm172_vm2, %v169_v62, %v168_v61 }
  0xf0   :  { %v175_v2 = vsel %vm174_vm3, %v170_v63, %v173_v1 }
  0xf1   :  { %v177_v3 = vsel %vm176_vm4, %v171_v0, %v175_v2 }
  0xf2   :  { %v178_v4 = vpack.c.b16 %v177_v3, %v177_v3 }
  0xf4   :  { %326 = vmatmul.mubr.bf16.vlgmr.msra.gmra.mxu1 %v178_v4 }
 0x1b4   :  { %v262_v6 = vpop.f32.mrf.mxu1 }
 0x1b5   :  { %v263_v7 = vadd.f32 %v282_v5, %v262_v6 }
 0x1b6   :  { %v327_v8 = vpop.f32.mrf.mxu1 }
 0x1b7   :  { %348 = vtanh.f32 %v263_v7 }
 0x1b8   :  { %v265_v9 = vpop.f32.mrf.mxu1 }
 0x1ba   :  { %v328_v10 = vpop.f32.mrf.mxu1 }
 0x1c4   :  { %v349_v11 = vpop.eup %348 }
 0x1c5   :  { %269 = vst [vmem:[%s453_s6] sm:$0xf] %v349_v11 }

// kernel: dim_forward.5
= control target key start
LH: loop header
LB: loop body
LE: loop exit
PB: predicated region body
PF: predicated region fallthrough
CT: control target
= control target key end

     0   :  { %s1675_s21 = smov 0   ;;  %s2001_s0 = inlined_call_operand.vmem [shape: bf16[32,128], index: 0, kind: input, shape index: {}]   ;;  %s2002_s1 = inlined_call_operand.vmem [shape: bf16[4,128], index: 1, kind: input, shape index: {}]   ;;  %s2003_s2 = inlined_call_operand.vmem [shape: bf16[128,128], index: 2, kind: input, shape index: {}]   ;;  %s2004_s3 = inlined_call_operand.vmem [shape: bf16[128,128], index: 3, kind: input, shape index: {}]   ;;  %s2005_s4 = inlined_call_operand.vmem [shape: f32[1,128], index: 4, kind: input, shape index: {}]   ;;  %s2006_s5 = inlined_call_operand.vmem [shape: bf16[128,1], index: 5, kind: input, shape index: {}]   ;;  %s2007_s6 = inlined_call_operand.vmem [shape: f32[32,4], index: 6, kind: output, shape index: {}]  }
   0x1 LB: > { %s1420_s22 = sadd.s32 4294967295, %s1631_s21   ;;  %p1424_p0 = scmp.ge.s32.totalorder %s1631_s21, 1  ;;  %s1631_s21 = sphi %s1675_s21, %s16_s21  }
   0x2   : > { %p213_p1 = scmp.lt.s32.totalorder %s1631_s21, 3 }
   0x4   : > { %p214_p2 = pnand %p1424_p0, %p213_p1 }
   0x5   : > { %s1425_s27 = sshll.u32 (!%p214_p2), %s1420_s22, 1 }
   0x6   : > { %217 = sbr.rel (%p214_p2) target bundleno = 849 (0x351), region = 44  ;;  %p244_p3 = scmp.lt.s32.totalorder (!%p214_p2), %s1425_s27, 3 }
   0xb   : > { %v1600_v0 = vld [vmem:[%s2003_s2 + $0x38] sm:$0xff]   ;;  %v1633_v1 = vmov 0.0   ;;  %v1601_v2 = vld [vmem:[%s2003_s2 + $0x30] sm:$0xff]   ;;  %vm1634_vm0 = vmmov 0   ;;  %s2011_s27 = smov (!%p244_p3, %s1425_s27), 3  ;;  %v1602_v3 = vld [vmem:[%s2003_s2 + $0x28] sm:$0xff]   ;;  %v375_v26 = vlaneseq }
   0xc   : > { %1499 = vmatprep.subr.bf16.mxu0 %v1633_v1  ;;  %1515 = vmatprep.mubr.msk.bf16.mxu0 %vm1634_vm0, %v1633_v1  ;;  %s1426_s30 = sshll.u32 %s2011_s27, 2  ;;  %v1603_v4 = vld [vmem:[%s2003_s2 + $0x20] sm:$0xff]   ;;  %v1604_v5 = vld [vmem:[%s2003_s2 + $0x18] sm:$0xff]   ;;  %v1605_v6 = vld [vmem:[%s2003_s2 + $0x10] sm:$0xff]   ;;  %v1635_v17 = vmov 0   ;;  %vm1209_vm2 = vcmask 27648  }
   0xd   : > { %1500 = vmatpush3.bf16.msra.mxu0 %v1600_v0  ;;  %s247_s9 = scalar_lea.vmem %s2001_s0, %s1426_s30  ;;  %v1606_v7 = vld [vmem:[%s2003_s2 + $0x8] sm:$0xff]   ;;  %v1607_v8 = vld [vmem:[%s2003_s2] sm:$0xff]   ;;  %v1609_v10 = vld [vmem:[%s2004_s3 + $0x38] sm:$0xff]   ;;  %1598 = vset.pattern.permute.xlu0 %v1635_v17  ;;  %v1636_v24 = vmov 1966171168   ;;  %v1776_v28 = vshrl.u32 %v375_v26, 7 }
   0xe   : > { %1501 = vmatprep.subr.bf16.mxu0 %v1633_v1  ;;  %v1608_v9 = vld [vmem:[%s247_s9] sm:$0xff]   ;;  %1519 = vmatprep.subr.bf16.mxu1 %v1609_v10  ;;  %v1610_v11 = vld [vmem:[%s2004_s3 + $0x30] sm:$0xff]   ;;  %v1611_v12 = vld [vmem:[%s2004_s3 + $0x28] sm:$0xff]   ;;  %v373_v25 = vunpack.c.l.s4 %v1636_v24  ;;  %v1637_v31 = vmov 1983009808   ;;  %vm1338_vm3 = vcmask 1041409  }
   0xf   : > { %1520 = vmatpush3.bf16.msra.mxu1 %v1609_v10  ;;  %v1612_v13 = vld [vmem:[%s2004_s3 + $0x20] sm:$0xff]   ;;  %v1613_v14 = vld [vmem:[%s2004_s3 + $0x18] sm:$0xff]   ;;  %v1614_v15 = vld [vmem:[%s2004_s3 + $0x10] sm:$0xff]   ;;  %1599 = vset.pattern.permute.xlu1 %v1635_v17  ;;  %v703_v32 = vunpack.c.l.s4 %v1637_v31  ;;  %v1780_v45 = vsub.s32 0, %v1776_v28  ;;  %vm1340_vm4 = vcmask 1042434   ;;  %vm1342_vm5 = vcmask 1043459  }
  0x10   : > { %1521 = vmatprep.subr.bf16.mxu1 %v1610_v11  ;;  %v1615_v16 = vld [vmem:[%s2004_s3 + $0x8] sm:$0xff]   ;;  %v1616_v18 = vld [vmem:[%s2004_s3] sm:$0xff]   ;;  %v1742_v19 = vld [vmem:[%s2006_s5 + $0x38] sm:$0xff]   ;;  %v374_v27 = vunpack.c.0.s8 %v373_v25  ;;  %vm1344_vm6 = vcmask 1044484   ;;  %vm1346_vm7 = vcmask 1045509   ;;  %vm1348_vm8 = vcmask 1046534  }
  0x11   : > { %1502 = vmatpush3.bf16.msra.mxu0 %v1601_v2  ;;  %v1747_v20 = vld [vmem:[%s2006_s5 + $0x30] sm:$0xff]   ;;  %v1756_v21 = vld [vmem:[%s2006_s5 + $0x28] sm:$0xff]   ;;  %v1763_v22 = vld [vmem:[%s2006_s5 + $0x20] sm:$0xff]   ;;  %v704_v38 = vunpack.c.0.s8 %v703_v32  ;;  %vm1350_vm9 = vcmask 1047559   ;;  %vm1361_vm10 = vcmask 31744   ;;  %s1428_s12 = sshll.u32 %s2011_s27, 3 }
  0x12   : > { %1503 = vmatprep.subr.bf16.mxu0 %v1633_v1  ;;  %v1770_v23 = vld [vmem:[%s2006_s5 + $0x18] sm:$0xff]   ;;  %v377_v33 = vsub.s32 %v374_v27, %v1776_v28  ;;  %s1982_s14 = scalar_lea.vmem %s2007_s6, %s1428_s12 }
  0x13   : > { %1522 = vmatpush3.bf16.msra.mxu1 %v1610_v11  ;;  %v1783_v46 = vsub.s32 %v704_v38, %v1776_v28 }
  0x14   : > { %1523 = vmatprep.subr.bf16.mxu1 %v1611_v12 }
  0x15   : > { %1504 = vmatpush3.bf16.msra.mxu0 %v1602_v3 }
  0x16   : > { %1505 = vmatprep.subr.bf16.mxu0 %v1633_v1 }
  0x17   : > { %1524 = vmatpush3.bf16.msra.mxu1 %v1611_v12 }
  0x18   : > { %1525 = vmatprep.subr.bf16.mxu1 %v1612_v13 }
  0x19   : > { %1506 = vmatpush3.bf16.msra.mxu0 %v1603_v4 }
  0x1a   : > { %1507 = vmatprep.subr.bf16.mxu0 %v1633_v1 }
  0x1b   : > { %1526 = vmatpush3.bf16.msra.mxu1 %v1612_v13 }
  0x1c   : > { %1527 = vmatprep.subr.bf16.mxu1 %v1613_v14 }
  0x1d   : > { %1508 = vmatpush3.bf16.msra.mxu0 %v1604_v5 }
  0x1e   : > { %1509 = vmatprep.subr.bf16.mxu0 %v1633_v1 }
  0x1f   : > { %1528 = vmatpush3.bf16.msra.mxu1 %v1613_v14 }
  0x20   : > { %1529 = vmatprep.subr.bf16.mxu1 %v1614_v15 }
  0x21   : > { %1510 = vmatpush3.bf16.msra.mxu0 %v1605_v6 }
  0x22   : > { %1511 = vmatprep.subr.bf16.mxu0 %v1633_v1 }
  0x23   : > { %1530 = vmatpush3.bf16.msra.mxu1 %v1614_v15 }
  0x24   : > { %1531 = vmatprep.subr.bf16.mxu1 %v1615_v16 }
  0x25   : > { %1512 = vmatpush3.bf16.msra.mxu0 %v1606_v7 }
  0x26   : > { %1513 = vmatprep.subr.bf16.mxu0 %v1633_v1 }
  0x27   : > { %1532 = vmatpush3.bf16.msra.mxu1 %v1615_v16 }
  0x28   : > { %1533 = vmatprep.subr.bf16.mxu1 %v1616_v18 }
  0x29   : > { %1514 = vmatpush3.bf16.msra.mxu0 %v1607_v8 }
  0x2a   : > { %1543 = vmatprep.subr.bf16.mxu0 %v1742_v19 }
  0x2b   : > { %1534 = vmatpush3.bf16.msra.mxu1 %v1616_v18 }
  0x2c   : > { %1516 = vmatmul.mubr.bf16.vlgmr.msra.gmra.mxu0 %v1608_v9  ;;  %1567 = vmatprep.subr.bf16.mxu1 %v1742_v19 }
  0x2d   : > { %1544 = vmatpush3.bf16.msra.mxu0 %v1742_v19 }
  0x2e   : > { %1545 = vmatprep.subr.bf16.mxu0 %v1747_v20 }
  0x31   : > { %1546 = vmatpush3.bf16.msra.mxu0 %v1747_v20 }
  0x32   : > { %1547 = vmatprep.subr.bf16.mxu0 %v1756_v21 }
  0x35   : > { %1548 = vmatpush3.bf16.msra.mxu0 %v1756_v21 }
  0x36   : > { %1549 = vmatprep.subr.bf16.mxu0 %v1763_v22 }
  0x39   : > { %1550 = vmatpush3.bf16.msra.mxu0 %v1763_v22 }
  0x3a   : > { %1551 = vmatprep.subr.bf16.mxu0 %v1770_v23 }
  0x3d   : > { %1552 = vmatpush3.bf16.msra.mxu0 %v1770_v23 }
  0xec   : > { %v362_v29 = vpop.f32.mrf.mxu0 }
  0xee   : > { %v1517_v30 = vpop.f32.mrf.mxu0 }
  0xf0   : > { %v365_v34 = vpop.f32.mrf.mxu0 }
  0xf1   : > { %v369_v35 = vpack.c.bf16 %v365_v34, %v362_v29  ;;  %v1438_v36 = vpack.c.bf16 %v365_v34, %v365_v34 }
  0xf2   : > { %v1518_v37 = vpop.f32.mrf.mxu0 }
  0xf3   : > { %v378_v39 = vrot.slane %v369_v35, %v377_v33  ;;  %v385_v40 = vrot.slane %v1438_v36, %v377_v33 }
  0xf5   : > { %v386_v41 = vcombine.high %v378_v39, %v378_v39  ;;  %v387_v42 = vcombine.high %v385_v40, %v385_v40  ;;  %v394_v43 = vrot.slane %v378_v39, %v377_v33  ;;  %v401_v44 = vrot.slane %v385_v40, %v377_v33 }
  0xf7   : > { %v408_v47 = vrot.slane %v386_v41, %v377_v33  ;;  %v415_v48 = vrot.slane %v387_v42, %v377_v33  ;;  %v416_v49 = vcombine.high %v394_v43, %v394_v43  ;;  %v417_v50 = vcombine.high %v401_v44, %v401_v44 }
  0xf8   : > { %v421_v51 = vunpack.i.h.s16 %v394_v43  ;;  %v429_v52 = vunpack.i.h.s16 %v401_v44  ;;  %v1439_v53 = vpack.i.b16 %v394_v43, %v394_v43  ;;  %v1443_v54 = vpack.i.b16 %v401_v44, %v401_v44 }
  0xf9   : > { %v418_v55 = vcombine.high %v408_v47, %v408_v47  ;;  %v419_v56 = vcombine.high %v415_v48, %v415_v48  ;;  %v423_v57 = vunpack.i.h.s16 %v408_v47  ;;  %v425_v58 = vunpack.i.h.s16 %v416_v49 }
  0xfa   : > { %v431_v59 = vunpack.i.h.s16 %v415_v48  ;;  %v433_v60 = vunpack.i.h.s16 %v417_v50  ;;  %v438_v61 = vpack.i.b16 %v421_v51, %v421_v51  ;;  %v1440_v62 = vpack.i.b16 %v408_v47, %v408_v47 }
  0xfb   : > { %v427_v63 = vunpack.i.h.s16 %v418_v55  ;;  %v435_v0 = vunpack.i.h.s16 %v419_v56  ;;  %v440_v1 = vpack.i.b16 %v423_v57, %v423_v57  ;;  %v1441_v2 = vpack.i.b16 %v416_v49, %v416_v49  ;;  %v1817_v49 = vld [vmem:[%s2002_s1] sm:$0x3] }
  0xfc   : > { %v442_v3 = vpack.i.b16 %v425_v58, %v425_v58  ;;  %v1442_v4 = vpack.i.b16 %v418_v55, %v418_v55  ;;  %v446_v5 = vpack.i.b16 %v429_v52, %v429_v52  ;;  %v1444_v6 = vpack.i.b16 %v415_v48, %v415_v48 }
  0xfd   : > { %v444_v7 = vpack.i.b16 %v427_v63, %v427_v63  ;;  %v448_v8 = vpack.i.b16 %v431_v59, %v431_v59  ;;  %v1445_v9 = vpack.i.b16 %v417_v50, %v417_v50  ;;  %v450_v10 = vpack.i.b16 %v433_v60, %v433_v60 }
  0xfe   : > { %v1446_v11 = vpack.i.b16 %v419_v56, %v419_v56  ;;  %v1785_v12 = vpack.i.b16 %v435_v0, %v435_v0  ;;  %v456_v13 = vrot.slane %v1439_v53, %v1780_v45  ;;  %v472_v14 = vrot.slane %v1441_v2, %v1780_v45 }
  0xff   : > { %v476_v15 = vrot.slane %v442_v3, %v1780_v45  ;;  %v480_v16 = vrot.slane %v1442_v4, %v1780_v45  ;;  %v488_v18 = vrot.slane %v1443_v54, %v1780_v45  ;;  %v492_v24 = vrot.slane %v446_v5, %v1780_v45 }
 0x100   : > { %v496_v25 = vrot.slane %v1444_v6, %v1780_v45  ;;  %v500_v27 = vrot.slane %v448_v8, %v1780_v45  ;;  %v1796_v29 = vrot.slane %v1445_v9, %v1780_v45  ;;  %v1799_v30 = vrot.slane %v450_v10, %v1780_v45 }
 0x101   : > { %v1802_v31 = vrot.slane %v1446_v11, %v1780_v45  ;;  %v546_v32 = vpack.i.b16 %v472_v14, %v472_v14  ;;  %v553_v33 = vpack.i.b16 %v476_v15, %v476_v15  ;;  %v574_v34 = vpack.i.b16 %v488_v18, %v488_v18 }
 0x102   : > { %v581_v35 = vpack.i.b16 %v492_v24, %v492_v24  ;;  %v588_v36 = vpack.i.b16 %v496_v25, %v496_v25  ;;  %v595_v37 = vpack.i.b16 %v500_v27, %v500_v27  ;;  %v602_v38 = vpack.i.b16 %v1796_v29, %v1796_v29 }
 0x103   : > { %v609_v39 = vpack.i.b16 %v1799_v30, %v1799_v30  ;;  %v460_v40 = vrot.slane %v438_v61, %v1780_v45  ;;  %v464_v41 = vrot.slane %v1440_v62, %v1780_v45  ;;  %v468_v42 = vrot.slane %v440_v1, %v1780_v45 }
 0x104   : > { %v518_v43 = vpack.i.b16 %v456_v13, %v456_v13  ;;  %v484_v44 = vrot.slane %v444_v7, %v1780_v45  ;;  %v551_v47 = vrot.slane %v546_v32, %v1780_v45  ;;  %v558_v48 = vrot.slane %v553_v33, %v1780_v45 }
 0x105   : > { %v525_v50 = vpack.i.b16 %v460_v40, %v460_v40  ;;  %v532_v51 = vpack.i.b16 %v464_v41, %v464_v41  ;;  %v539_v52 = vpack.i.b16 %v468_v42, %v468_v42  ;;  %v560_v53 = vpack.i.b16 %v480_v16, %v480_v16 }
 0x106   : > { %v523_v54 = vrot.slane %v518_v43, %v1780_v45  ;;  %v567_v55 = vpack.i.b16 %v484_v44, %v484_v44  ;;  %v633_v56 = vadd.bf16 %v551_v47, %v1817_v49  ;;  %v634_v57 = vadd.bf16 %v558_v48, %v1817_v49 }
 0x107   : > { %v530_v58 = vrot.slane %v525_v50, %v1780_v45  ;;  %v537_v59 = vrot.slane %v532_v51, %v1780_v45  ;;  %v544_v60 = vrot.slane %v539_v52, %v1780_v45  ;;  %v565_v61 = vrot.slane %v560_v53, %v1780_v45 }
 0x108   : > { %v629_v62 = vadd.bf16 %v523_v54, %v1817_v49  ;;  %v572_v63 = vrot.slane %v567_v55, %v1780_v45  ;;  %v649_v0 = vmax.bf16 %v1635_v17, %v633_v56  ;;  %v650_v1 = vmax.bf16 %v1635_v17, %v634_v57 }
 0x109   : > { %v630_v2 = vadd.bf16 %v530_v58, %v1817_v49  ;;  %v631_v3 = vadd.bf16 %v537_v59, %v1817_v49  ;;  %v632_v4 = vadd.bf16 %v544_v60, %v1817_v49  ;;  %v635_v5 = vadd.bf16 %v565_v61, %v1817_v49 }
 0x10a   : > { %v645_v6 = vmax.bf16 %v1635_v17, %v629_v62  ;;  %v636_v7 = vadd.bf16 %v572_v63, %v1817_v49  ;;  %v717_v8 = vcombine.low %v649_v0, %v650_v1  ;;  %v579_v9 = vrot.slane %v574_v34, %v1780_v45 }
 0x10b   : > { %v646_v10 = vmax.bf16 %v1635_v17, %v630_v2  ;;  %v647_v11 = vmax.bf16 %v1635_v17, %v631_v3  ;;  %v648_v13 = vmax.bf16 %v1635_v17, %v632_v4  ;;  %v651_v14 = vmax.bf16 %v1635_v17, %v635_v5 }
 0x10c   : > { %v652_v15 = vmax.bf16 %v1635_v17, %v636_v7  ;;  %v725_v16 = vrot.slane %v717_v8, %v1783_v46  ;;  %v586_v18 = vrot.slane %v581_v35, %v1780_v45  ;;  %v593_v24 = vrot.slane %v588_v36, %v1780_v45 }
 0x10d   : > { %v700_v25 = vcombine.low %v645_v6, %v646_v10  ;;  %v701_v27 = vcombine.low %v647_v11, %v648_v13  ;;  %v600_v29 = vrot.slane %v595_v37, %v1780_v45  ;;  %v637_v30 = vadd.bf16 %v579_v9, %v1817_v49 }
 0x10e   : > { %v718_v32 = vcombine.low %v651_v14, %v652_v15  ;;  %v638_v33 = vadd.bf16 %v586_v18, %v1817_v49  ;;  %v639_v34 = vadd.bf16 %v593_v24, %v1817_v49  ;;  %v516_v40 = vrot.slane %v1785_v12, %v1780_v45 }
 0x10f   : > { %v708_v41 = vrot.slane %v700_v25, %v1783_v46  ;;  %v715_v35 = vrot.slane %v701_v27, %v1783_v46  ;;  %v640_v36 = vadd.bf16 %v600_v29, %v1817_v49  ;;  %v653_v42 = vmax.bf16 %v1635_v17, %v637_v30 }
 0x110   : > { %v732_v37 = vrot.slane %v718_v32, %v1783_v46  ;;  %v654_v43 = vmax.bf16 %v1635_v17, %v638_v33  ;;  %v655_v44 = vmax.bf16 %v1635_v17, %v639_v34  ;;  %v607_v47 = vrot.slane %v602_v38, %v1780_v45 }
 0x111   : > { %v716_v48 = vcombine.low %v708_v41, %v715_v35  ;;  %v656_v50 = vmax.bf16 %v1635_v17, %v640_v36  ;;  %v614_v12 = vrot.slane %v609_v39, %v1780_v45  ;;  %v616_v51 = vpack.i.b16 %v1802_v31, %v1802_v31 }
 0x112   : > { %v733_v52 = vcombine.low %v725_v16, %v732_v37  ;;  %v734_v53 = vcombine.low %v653_v42, %v654_v43  ;;  %v623_v54 = vpack.i.b16 %v516_v40, %v516_v40  ;;  %v641_v55 = vadd.bf16 %v607_v47, %v1817_v49 }
 0x113   : > { %1535 = vmatprep.mubr.bf16.mxu1 %v716_v48  ;;  %v735_v56 = vcombine.low %v655_v44, %v656_v50  ;;  %v621_v57 = vrot.slane %v616_v51, %v1780_v45  ;;  %v642_v58 = vadd.bf16 %v614_v12, %v1817_v49 }
 0x114   : > { %1536 = vmatmul.mubr.bf16.vlgmr.msra.gmra.mxu1 %v733_v52  ;;  %v628_v38 = vrot.slane %v623_v54, %v1780_v45  ;;  %v742_v59 = vrot.slane %v734_v53, %v1783_v46  ;;  %v657_v62 = vmax.bf16 %v1635_v17, %v641_v55  ;;  %v1638_v52 = vmov 839922192  }
 0x115   : > { %v749_v39 = vrot.slane %v735_v56, %v1783_v46  ;;  %v643_v31 = vadd.bf16 %v621_v57, %v1817_v49  ;;  %v658_v60 = vmax.bf16 %v1635_v17, %v642_v58  ;;  %1575 = vmatpush3.bf16.msra.mxu1 %v1742_v19  ;;  %v1059_v53 = vunpack.c.l.s4 %v1638_v52 }
 0x116   : > { %v644_v61 = vadd.bf16 %v628_v38, %v1817_v49  ;;  %1568 = vmatprep.subr.bf16.mxu1 %v1747_v20  ;;  %v1639_v54 = vmov 1985246804   ;;  %v1189_v58 = vand.u32 127, %v375_v26 }
 0x117   : > { %v750_v63 = vcombine.low %v742_v59, %v749_v39  ;;  %v659_v0 = vmax.bf16 %v1635_v17, %v643_v31  ;;  %v751_v1 = vcombine.low %v657_v62, %v658_v60  ;;  %v1066_v55 = vunpack.c.l.s4 %v1639_v54 }
 0x118   : > { %v660_v45 = vmax.bf16 %v1635_v17, %v644_v61  ;;  %v1622_v17 = vld [vmem:[%s2006_s5 + $0x10] sm:$0xff]   ;;  %v1060_v56 = vunpack.c.0.s8 %v1059_v53  ;;  %vm1906_vm1 = vcmp.eq.s32.totalorder %v1776_v28, %v1189_v58 }
 0x119   : > { %1539 = vmatprep.mubr.bf16.mxu1 %v750_v63  ;;  %1576 = vmatpush3.bf16.msra.mxu1 %v1747_v20  ;;  %v759_v19 = vrot.slane %v751_v1, %v1783_v46  ;;  %v1623_v20 = vld [vmem:[%s2006_s5 + $0x8] sm:$0xff]   ;;  %v1067_v57 = vunpack.c.0.s8 %v1066_v55 }
 0x11a   : > { %v752_v2 = vcombine.low %v659_v0, %v660_v45  ;;  %1569 = vmatprep.subr.bf16.mxu1 %v1756_v21  ;;  %1553 = vmatprep.subr.bf16.mxu0 %v1622_v17  ;;  %v1900_v38 = vsub.s32 %v1060_v56, %v1776_v28 }
 0x11b   : > { %1554 = vmatpush3.bf16.msra.mxu0 %v1622_v17  ;;  %v1903_v59 = vsub.s32 %v1067_v57, %v1776_v28 }
 0x11c   : > { %v766_v49 = vrot.slane %v752_v2, %v1783_v46  ;;  %1555 = vmatprep.subr.bf16.mxu0 %v1623_v20  ;;  %v1447_v46 = vld [vmem:[%s2005_s4] ss:$0 sm:$0xff] }
 0x11d   : > { %1577 = vmatpush3.bf16.msra.mxu1 %v1756_v21  ;;  %v1624_v21 = vld [vmem:[%s2006_s5] sm:$0xff]  }
 0x11e   : > { %v767_v3 = vcombine.low %v759_v19, %v766_v49  ;;  %1570 = vmatprep.subr.bf16.mxu1 %v1763_v22 }
 0x11f   : > { %1556 = vmatpush3.bf16.msra.mxu0 %v1623_v20 }
 0x120   : > { %1540 = vmatmul.mubr.bf16.gmra.mxu1 %v767_v3  ;;  %1557 = vmatprep.subr.bf16.mxu0 %v1624_v21 }
 0x121   : > { %1578 = vmatpush3.bf16.msra.mxu1 %v1763_v22 }
 0x122   : > { %1571 = vmatprep.subr.bf16.mxu1 %v1770_v23 }
 0x123   : > { %1558 = vmatpush3.bf16.msra.mxu0 %v1624_v21 }
 0x125   : > { %1579 = vmatpush3.bf16.msra.mxu1 %v1770_v23 }
 0x126   : > { %1572 = vmatprep.subr.bf16.mxu1 %v1622_v17 }
 0x129   : > { %1580 = vmatpush3.bf16.msra.mxu1 %v1622_v17 }
 0x12a   : > { %1573 = vmatprep.subr.bf16.mxu1 %v1623_v20 }
 0x12d   : > { %1581 = vmatpush3.bf16.msra.mxu1 %v1623_v20 }
 0x12e   : > { %1574 = vmatprep.subr.bf16.mxu1 %v1624_v21 }
 0x131   : > { %1582 = vmatpush3.bf16.msra.mxu1 %v1624_v21 }
 0x1d4   : > { %v1537_v22 = vpop.f32.mrf.mxu1 }
 0x1d5   : > { %v863_v7 = vadd.f32 %v1537_v22, %v1447_v46 }
 0x1d6   : > { %v854_v23 = vpop.f32.mrf.mxu1 }
 0x1d7   : > { %v855_v5 = vadd.f32 %v1447_v46, %v854_v23  ;;  %v887_v14 = vmax.f32 %v863_v7, 0.0 }
 0x1d8   : > { %v1538_v4 = vpop.f32.mrf.mxu1 }
 0x1d9   : > { %v866_v6 = vadd.f32 %v1538_v4, %v1447_v46  ;;  %v885_v11 = vmax.f32 %v855_v5, 0.0 }
 0x1da   : > { %v857_v8 = vpop.f32.mrf.mxu1 }
 0x1db   : > { %v858_v9 = vadd.f32 %v1447_v46, %v857_v8  ;;  %v888_v10 = vmax.f32 %v866_v6, 0.0 }
 0x1dd   : > { %v886_v13 = vmax.f32 %v858_v9, 0.0  ;;  %v894_v16 = vpack.c.bf16 %v888_v10, %v887_v14 }
 0x1df   : > { %v893_v15 = vpack.c.bf16 %v886_v13, %v885_v11 }
 0x1e0   : > { %v1541_v18 = vpop.f32.mrf.mxu1 }
 0x1e1   : > { %1559 = vmatprep.mubr.bf16.mxu0 %v893_v15  ;;  %v879_v30 = vadd.f32 %v1541_v18, %v1447_v46 }
 0x1e2   : > { %v870_v24 = vpop.f32.mrf.mxu1  ;;  %1560 = vmatmul.mubr.bf16.vlgmr.msra.gmra.mxu0 %v894_v16 }
 0x1e3   : > { %v871_v27 = vadd.f32 %v1447_v46, %v870_v24  ;;  %v891_v35 = vmax.f32 %v879_v30, 0.0 }
 0x1e4   : > { %v1542_v25 = vpop.f32.mrf.mxu1 }
 0x1e5   : > { %v882_v29 = vadd.f32 %v1542_v25, %v1447_v46  ;;  %v889_v40 = vmax.f32 %v871_v27, 0.0 }
 0x1e6   : > { %v873_v32 = vpop.f32.mrf.mxu1 }
 0x1e7   : > { %v874_v33 = vadd.f32 %v1447_v46, %v873_v32  ;;  %v892_v34 = vmax.f32 %v882_v29, 0.0 }
 0x1e9   : > { %v890_v41 = vmax.f32 %v874_v33, 0.0  ;;  %v896_v42 = vpack.c.bf16 %v892_v34, %v891_v35 }
 0x1eb   : > { %v895_v36 = vpack.c.bf16 %v890_v41, %v889_v40 }
 0x1ed   : > { %1563 = vmatprep.mubr.bf16.mxu1 %v895_v36 }
 0x1ee   : > { %1564 = vmatmul.mubr.bf16.vlgmr.msra.gmra.mxu1 %v896_v42 }
 0x2a2   : > { %v1561_v37 = vpop.f32.mrf.mxu0 }
 0x2a3   : > { %1036 = vperm.xlu0 %1598, %v1561_v37  }
 0x2a4   : > { %v995_v43 = vpop.f32.mrf.mxu0 }
 0x2a6   : > { %v1562_v44 = vpop.f32.mrf.mxu0 }
 0x2a7   : > { %1028 = vperm.xlu0 %1598, %v995_v43  }
 0x2a8   : > { %v998_v47 = vpop.f32.mrf.mxu0 }
 0x2ab   : > { %1032 = vperm.xlu0 %1598, %v998_v47  }
 0x2ae   : > { %v1565_v48 = vpop.f32.mrf.mxu1 }
 0x2af   : > { %1052 = vperm.xlu1 %1599, %v1565_v48   ;;  %1040 = vperm.xlu0 %1598, %v1562_v44  }
 0x2b0   : > { %v1011_v50 = vpop.f32.mrf.mxu1 }
 0x2b2   : > { %v1566_v12 = vpop.f32.mrf.mxu1 }
 0x2b3   : > { %1044 = vperm.xlu1 %1599, %v1011_v50  }
 0x2b4   : > { %v1014_v51 = vpop.f32.mrf.mxu1 }
 0x2b7   : > { %1048 = vperm.xlu1 %1599, %v1014_v51  }
 0x2bb   : > { %1056 = vperm.xlu1 %1599, %v1566_v12  }
 0x31e   : > { %v1037_v31 = vpop.permute.xlu0 %1036 }
 0x31f   : > { %v1092_v60 = vrot.slane %v1037_v31, %v1900_v38  ;;  %v1099_v61 = vrot.slane %v1037_v31, %v1903_v59 }
 0x321   : > { %v1197_v26 = vsel %vm1906_vm1, %v1092_v60, 0.0  ;;  %v1198_v62 = vsel %vm1906_vm1, %v1099_v61, 0.0 }
 0x322   : > { %v1238_v63 = vsel %vm1209_vm2, %v1197_v26, 0.0  ;;  %v1245_v0 = vsel %vm1209_vm2, %v1198_v62, 0.0  ;;  %v1029_v28 = vpop.permute.xlu0 %1028 }
 0x323   : > { %v1239_v45 = vrot.slane %v1238_v63, 4  ;;  %v1064_v1 = vrot.slane %v1029_v28, %v1900_v38  ;;  %v1071_v2 = vrot.slane %v1029_v28, %v1903_v59  ;;  %v1246_v49 = vrot.slane %v1245_v0, 4 }
 0x325   : > { %v1240_v19 = vadd.f32 %v1239_v45, %v1238_v63  ;;  %v1193_v3 = vsel %vm1906_vm1, %v1064_v1, 0.0  ;;  %v1194_v17 = vsel %vm1906_vm1, %v1071_v2, 0.0  ;;  %v1247_v7 = vadd.f32 %v1246_v49, %v1245_v0 }
 0x326   : > { %v1210_v20 = vsel %vm1209_vm2, %v1193_v3, 0.0  ;;  %v1217_v21 = vsel %vm1209_vm2, %v1194_v17, 0.0  ;;  %v1033_v22 = vpop.permute.xlu0 %1032 }
 0x327   : > { %v1211_v23 = vrot.slane %v1210_v20, 4  ;;  %v1218_v46 = vrot.slane %v1217_v21, 4  ;;  %v1078_v4 = vrot.slane %v1033_v22, %v1900_v38  ;;  %v1085_v5 = vrot.slane %v1033_v22, %v1903_v59 }
 0x328   : > { %v1241_v6 = vrot.slane %v1240_v19, 2  ;;  %v1248_v29 = vrot.slane %v1247_v7, 2 }
 0x329   : > { %v1212_v8 = vadd.f32 %v1211_v23, %v1210_v20  ;;  %v1219_v9 = vadd.f32 %v1218_v46, %v1217_v21  ;;  %v1195_v11 = vsel %vm1906_vm1, %v1078_v4, 0.0  ;;  %v1196_v13 = vsel %vm1906_vm1, %v1085_v5, 0.0 }
 0x32a   : > { %v1053_v10 = vpop.permute.xlu1 %1052  ;;  %v1224_v24 = vsel %vm1209_vm2, %v1195_v11, 0.0  ;;  %v1231_v25 = vsel %vm1209_vm2, %v1196_v13, 0.0  ;;  %v1242_v27 = vadd.f32 %v1241_v6, %v1240_v19  ;;  %v1041_v48 = vpop.permute.xlu0 %1040  ;;  %v1249_v50 = vadd.f32 %v1248_v29, %v1247_v7 }
 0x32b   : > { %v1213_v14 = vrot.slane %v1212_v8, 2  ;;  %v1220_v15 = vrot.slane %v1219_v9, 2  ;;  %v1148_v16 = vrot.slane %v1053_v10, %v1900_v38  ;;  %v1155_v18 = vrot.slane %v1053_v10, %v1903_v59 }
 0x32c   : > { %v1225_v40 = vrot.slane %v1224_v24, 4  ;;  %v1232_v41 = vrot.slane %v1231_v25, 4  ;;  %v1243_v52 = vrot.slane %v1242_v27, 1  ;;  %v1106_v31 = vrot.slane %v1041_v48, %v1900_v38 }
 0x32d   : > { %v1214_v30 = vadd.f32 %v1213_v14, %v1212_v8  ;;  %v1221_v32 = vadd.f32 %v1220_v15, %v1219_v9  ;;  %v1205_v33 = vsel %vm1906_vm1, %v1148_v16, 0.0  ;;  %v1206_v34 = vsel %vm1906_vm1, %v1155_v18, 0.0 }
 0x32e   : > { %v1045_v35 = vpop.permute.xlu1 %1044  ;;  %v1294_v42 = vsel %vm1209_vm2, %v1205_v33, 0.0  ;;  %v1301_v43 = vsel %vm1209_vm2, %v1206_v34, 0.0  ;;  %v1226_v44 = vadd.f32 %v1225_v40, %v1224_v24  ;;  %v1233_v47 = vadd.f32 %v1232_v41, %v1231_v25 }
 0x32f   : > { %v1215_v36 = vrot.slane %v1214_v30, 1  ;;  %v1222_v37 = vrot.slane %v1221_v32, 1  ;;  %v1120_v12 = vrot.slane %v1045_v35, %v1900_v38  ;;  %v1127_v51 = vrot.slane %v1045_v35, %v1903_v59 }
 0x330   : > { %v1295_v53 = vrot.slane %v1294_v42, 4  ;;  %v1227_v54 = vrot.slane %v1226_v44, 2  ;;  %v1234_v55 = vrot.slane %v1233_v47, 2  ;;  %v1302_v56 = vrot.slane %v1301_v43, 4 }
 0x331   : > { %v1201_v57 = vsel %vm1906_vm1, %v1120_v12, 0.0  ;;  %v1202_v58 = vsel %vm1906_vm1, %v1127_v51, 0.0  ;;  %v1216_v60 = vadd.f32 %v1215_v36, %v1214_v30  ;;  %v1223_v61 = vadd.f32 %v1222_v37, %v1221_v32 }
 0x332   : > { %v1228_v26 = vadd.f32 %v1227_v54, %v1226_v44  ;;  %v1235_v62 = vadd.f32 %v1234_v55, %v1233_v47  ;;  %v1266_v63 = vsel %vm1209_vm2, %v1201_v57, 0.0  ;;  %v1273_v0 = vsel %vm1209_vm2, %v1202_v58, 0.0  ;;  %v1049_v1 = vpop.permute.xlu1 %1048 }
 0x333   : > { %v1113_v28 = vrot.slane %v1041_v48, %v1903_v59  ;;  %v1199_v45 = vsel %vm1906_vm1, %v1106_v31, 0.0  ;;  %v1250_v2 = vrot.slane %v1249_v50, 1  ;;  %v1296_v19 = vadd.f32 %v1295_v53, %v1294_v42 }
 0x334   : > { %v1229_v49 = vrot.slane %v1228_v26, 1  ;;  %v1236_v3 = vrot.slane %v1235_v62, 1  ;;  %v1267_v17 = vrot.slane %v1266_v63, 4  ;;  %v1274_v20 = vrot.slane %v1273_v0, 4 }
 0x335   : > { %v1200_v21 = vsel %vm1906_vm1, %v1113_v28, 0.0  ;;  %v1252_v22 = vsel %vm1209_vm2, %v1199_v45, 0.0  ;;  %v1339_v23 = vsel %vm1338_vm3, %v1223_v61, %v1216_v60  ;;  %v1303_v46 = vadd.f32 %v1302_v56, %v1301_v43 }
 0x336   : > { %v1230_v4 = vadd.f32 %v1229_v49, %v1228_v26  ;;  %v1237_v5 = vadd.f32 %v1236_v3, %v1235_v62  ;;  %v1268_v6 = vadd.f32 %v1267_v17, %v1266_v63  ;;  %v1275_v7 = vadd.f32 %v1274_v20, %v1273_v0  ;;  %v1057_v25 = vpop.permute.xlu1 %1056 }
 0x337   : > { %v1253_v8 = vrot.slane %v1252_v22, 4  ;;  %v1259_v9 = vsel %vm1209_vm2, %v1200_v21, 0.0  ;;  %v1244_v10 = vadd.f32 %v1243_v52, %v1242_v27  ;;  %v1297_v11 = vrot.slane %v1296_v19, 2 }
 0x338   : > { %v1341_v13 = vsel %vm1340_vm4, %v1230_v4, %v1339_v23  ;;  %v1260_v14 = vrot.slane %v1259_v9, 4  ;;  %v1269_v16 = vrot.slane %v1268_v6, 2  ;;  %v1276_v18 = vrot.slane %v1275_v7, 2 }
 0x339   : > { %v1343_v15 = vsel %vm1342_vm5, %v1237_v5, %v1341_v13  ;;  %v1254_v24 = vadd.f32 %v1253_v8, %v1252_v22  ;;  %v1251_v29 = vadd.f32 %v1250_v2, %v1249_v50  ;;  %v1134_v32 = vrot.slane %v1049_v1, %v1900_v38 }
 0x33a   : > { %v1261_v30 = vadd.f32 %v1260_v14, %v1259_v9  ;;  %v1141_v33 = vrot.slane %v1049_v1, %v1903_v59  ;;  %v1304_v27 = vrot.slane %v1303_v46, 2  ;;  %v1345_v34 = vsel %vm1344_vm6, %v1244_v10, %v1343_v15 }
 0x33b   : > { %v1270_v40 = vadd.f32 %v1269_v16, %v1268_v6  ;;  %v1255_v41 = vrot.slane %v1254_v24, 2  ;;  %v1203_v36 = vsel %vm1906_vm1, %v1134_v32, 0.0  ;;  %v1162_v37 = vrot.slane %v1057_v25, %v1900_v38 }
 0x33c   : > { %v1262_v35 = vrot.slane %v1261_v30, 2  ;;  %v1204_v42 = vsel %vm1906_vm1, %v1141_v33, 0.0  ;;  %v1298_v43 = vadd.f32 %v1297_v11, %v1296_v19  ;;  %v1277_v44 = vadd.f32 %v1276_v18, %v1275_v7 }
 0x33d   : > { %v1256_v47 = vadd.f32 %v1255_v41, %v1254_v24  ;;  %v1280_v48 = vsel %vm1209_vm2, %v1203_v36, 0.0  ;;  %v1287_v51 = vsel %vm1209_vm2, %v1204_v42, 0.0  ;;  %v1169_v52 = vrot.slane %v1057_v25, %v1903_v59 }
 0x33e   : > { %v1263_v50 = vadd.f32 %v1262_v35, %v1261_v30  ;;  %v1281_v12 = vrot.slane %v1280_v48, 4  ;;  %v1271_v53 = vrot.slane %v1270_v40, 1  ;;  %v1347_v54 = vsel %vm1346_vm7, %v1251_v29, %v1345_v34 }
 0x33f   : > { %v1257_v55 = vrot.slane %v1256_v47, 1  ;;  %v1288_v56 = vrot.slane %v1287_v51, 4  ;;  %v1207_v38 = vsel %vm1906_vm1, %v1162_v37, 0.0  ;;  %v1208_v31 = vsel %vm1906_vm1, %v1169_v52, 0.0 }
 0x340   : > { %v1264_v57 = vrot.slane %v1263_v50, 1  ;;  %v1282_v58 = vadd.f32 %v1281_v12, %v1280_v48  ;;  %v1278_v60 = vrot.slane %v1277_v44, 1  ;;  %v1308_v62 = vsel %vm1209_vm2, %v1207_v38, 0.0 }
 0x341   : > { %v1258_v61 = vadd.f32 %v1257_v55, %v1256_v47  ;;  %v1289_v26 = vadd.f32 %v1288_v56, %v1287_v51  ;;  %v1309_v0 = vrot.slane %v1308_v62, 4  ;;  %v1315_v28 = vsel %vm1209_vm2, %v1208_v31, 0.0 }
 0x342   : > { %v1265_v59 = vadd.f32 %v1264_v57, %v1263_v50  ;;  %v1283_v63 = vrot.slane %v1282_v58, 2  ;;  %v1305_v45 = vadd.f32 %v1304_v27, %v1303_v46  ;;  %v1316_v2 = vrot.slane %v1315_v28, 4 }
 0x343   : > { %v1349_v39 = vsel %vm1348_vm8, %v1258_v61, %v1347_v54  ;;  %v1290_v1 = vrot.slane %v1289_v26, 2  ;;  %v1310_v3 = vadd.f32 %v1309_v0, %v1308_v62  ;;  %v1272_v17 = vadd.f32 %v1271_v53, %v1270_v40 }
 0x344   : > { %v1351_v19 = vsel %vm1350_vm9, %v1265_v59, %v1349_v39  ;;  %v1284_v49 = vadd.f32 %v1283_v63, %v1282_v58  ;;  %v1279_v20 = vadd.f32 %v1278_v60, %v1277_v44  ;;  %v1317_v22 = vadd.f32 %v1316_v2, %v1315_v28 }
 0x345   : > { %1362 = vst.msk [vmem:[%s1982_s14] sm:$0xff] %vm1361_vm10, %v1351_v19  ;;  %v1291_v21 = vadd.f32 %v1290_v1, %v1289_v26  ;;  %v1299_v23 = vrot.slane %v1298_v43, 1  ;;  %v1311_v5 = vrot.slane %v1310_v3, 2  ;;  %v1306_v6 = vrot.slane %v1305_v45, 1 }
 0x346   : > { %v1285_v4 = vrot.slane %v1284_v49, 1  ;;  %v1318_v46 = vrot.slane %v1317_v22, 2  ;;  %v1352_v10 = vsel %vm1338_vm3, %v1279_v20, %v1272_v17 }
 0x347   : > { %v1292_v7 = vrot.slane %v1291_v21, 1  ;;  %v1312_v9 = vadd.f32 %v1311_v5, %v1310_v3  ;;  %v1300_v14 = vadd.f32 %v1299_v23, %v1298_v43  ;;  %v1307_v18 = vadd.f32 %v1306_v6, %v1305_v45 }
 0x348   : > { %v1286_v8 = vadd.f32 %v1285_v4, %v1284_v49  ;;  %v1319_v13 = vadd.f32 %v1318_v46, %v1317_v22 }
 0x349   : > { %v1293_v11 = vadd.f32 %v1292_v7, %v1291_v21  ;;  %v1313_v16 = vrot.slane %v1312_v9, 1 }
 0x34a   : > { %v1353_v15 = vsel %vm1340_vm4, %v1286_v8, %v1352_v10  ;;  %v1320_v25 = vrot.slane %v1319_v13, 1 }
 0x34b   : > { %v1354_v24 = vsel %vm1342_vm5, %v1293_v11, %v1353_v15  ;;  %v1314_v30 = vadd.f32 %v1313_v16, %v1312_v9 }
 0x34c   : > { %v1355_v29 = vsel %vm1344_vm6, %v1300_v14, %v1354_v24  ;;  %v1321_v33 = vadd.f32 %v1320_v25, %v1319_v13 }
 0x34d   : > { %v1356_v32 = vsel %vm1346_vm7, %v1307_v18, %v1355_v29 }
 0x34e   : > { %v1357_v27 = vsel %vm1348_vm8, %v1314_v30, %v1356_v32 }
 0x34f   : > { %v1358_v34 = vsel %vm1350_vm9, %v1321_v33, %v1357_v27 }
 0x350   : > { %1363 = vst.msk [vmem:[%s1982_s14 + $0x8] sm:$0xff] %vm1361_vm10, %v1358_v34 }
 0x351 PF: > { %s16_s21 = sadd.s32 1, %s1631_s21  }
 0x352   : > { %p13_p4 = scmp.ge.s32.totalorder %s16_s21, 4  }
 0x354   :  { %15 = sbr.rel (!%p13_p4) target bundleno = 1 (0x1), region = 74 }

// kernel: dim_forward.4
= control target key start
LH: loop header
LB: loop body
LE: loop exit
PB: predicated region body
PF: predicated region fallthrough
CT: control target
= control target key end

     0   :  { %v113_v29 = vlaneseq  ;;  %v1210_v35 = vmov 1983009808   ;;  %v1211_v37 = vmov 0.0   ;;  %vm1212_vm0 = vmmov 0   ;;  %s1500_s0 = inlined_call_operand.vmem [shape: bf16[4,640], index: 0, kind: input, shape index: {}]   ;;  %s1501_s1 = inlined_call_operand.vmem [shape: bf16[4,128], index: 1, kind: input, shape index: {}]   ;;  %s1502_s2 = inlined_call_operand.vmem [shape: bf16[640,128], index: 2, kind: input, shape index: {}]   ;;  %s1503_s3 = inlined_call_operand.vmem [shape: bf16[128,128], index: 3, kind: input, shape index: {}]   ;;  %s1504_s4 = inlined_call_operand.vmem [shape: f32[1,128], index: 4, kind: input, shape index: {}]   ;;  %s1505_s5 = inlined_call_operand.vmem [shape: bf16[128,1], index: 5, kind: input, shape index: {}]   ;;  %s1506_s6 = inlined_call_operand.hbm [shape: f32[4,4], index: 6, kind: output, shape index: {}]  }
   0x1   :  { %v1131_v0 = vld [vmem:[%s1502_s2 + $0x78] sm:$0xff]   ;;  %v1135_v4 = vld [vmem:[%s1502_s2 + $0x70] sm:$0xff]   ;;  %v1139_v8 = vld [vmem:[%s1502_s2 + $0x68] sm:$0xff]   ;;  %v111_v36 = vunpack.c.l.s4 %v1210_v35 }
   0x2   :  { %v1132_v1 = vld [vmem:[%s1502_s2 + $0xf8] sm:$0xff]   ;;  %991 = vmatprep.subr.bf16.mxu0 %v1131_v0  ;;  %v1136_v5 = vld [vmem:[%s1502_s2 + $0xf0] sm:$0xff]   ;;  %v1140_v9 = vld [vmem:[%s1502_s2 + $0xe8] sm:$0xff]   ;;  %v1353_v34 = vshrl.u32 %v113_v29, 7 }
   0x3   :  { %v1133_v2 = vld [vmem:[%s1502_s2 + $0x38] sm:$0xff]   ;;  %1013 = vmatprep.subr.bf16.mxu1 %v1132_v1  ;;  %v1137_v6 = vld [vmem:[%s1502_s2 + $0x30] sm:$0xff]   ;;  %v1141_v10 = vld [vmem:[%s1502_s2 + $0x28] sm:$0xff]   ;;  %v112_v38 = vunpack.c.0.s8 %v111_v36 }
   0x4   :  { %v1134_v3 = vld [vmem:[%s1502_s2 + $0xb8] sm:$0xff]   ;;  %992 = vmatpush3.bf16.msra.mxu0 %v1133_v2  ;;  %v1138_v7 = vld [vmem:[%s1502_s2 + $0xb0] sm:$0xff]   ;;  %v1142_v11 = vld [vmem:[%s1502_s2 + $0xa8] sm:$0xff]  }
   0x5   :  { %1014 = vmatpush3.bf16.msra.mxu1 %v1134_v3  ;;  %993 = vmatprep.subr.bf16.mxu0 %v1135_v4  ;;  %v1143_v12 = vld [vmem:[%s1502_s2 + $0x60] sm:$0xff]   ;;  %v1147_v16 = vld [vmem:[%s1502_s2 + $0x58] sm:$0xff]   ;;  %v1151_v20 = vld [vmem:[%s1502_s2 + $0x50] sm:$0xff]   ;;  %v1358_v40 = vsub.s32 %v112_v38, %v1353_v34 }
   0x6   :  { %1015 = vmatprep.subr.bf16.mxu1 %v1136_v5  ;;  %v1144_v13 = vld [vmem:[%s1502_s2 + $0xe0] sm:$0xff]   ;;  %v1148_v17 = vld [vmem:[%s1502_s2 + $0xd8] sm:$0xff]   ;;  %v1152_v21 = vld [vmem:[%s1502_s2 + $0xd0] sm:$0xff]  }
   0x7   :  { %v1145_v14 = vld [vmem:[%s1502_s2 + $0x20] sm:$0xff]   ;;  %v1149_v18 = vld [vmem:[%s1502_s2 + $0x18] sm:$0xff]   ;;  %v1153_v22 = vld [vmem:[%s1502_s2 + $0x10] sm:$0xff]  }
   0x8   :  { %994 = vmatpush3.bf16.msra.mxu0 %v1137_v6  ;;  %v1146_v15 = vld [vmem:[%s1502_s2 + $0xa0] sm:$0xff]   ;;  %v1150_v19 = vld [vmem:[%s1502_s2 + $0x98] sm:$0xff]   ;;  %v1154_v23 = vld [vmem:[%s1502_s2 + $0x90] sm:$0xff]  }
   0x9   :  { %1016 = vmatpush3.bf16.msra.mxu1 %v1138_v7  ;;  %995 = vmatprep.subr.bf16.mxu0 %v1139_v8  ;;  %v1155_v24 = vld [vmem:[%s1502_s2 + $0x48] sm:$0xff]   ;;  %v1159_v28 = vld [vmem:[%s1502_s2 + $0x40] sm:$0xff]   ;;  %v1164_v43 = vld [vmem:[%s1502_s2 + $0x138] sm:$0xff]  }
   0xa   :  { %1017 = vmatprep.subr.bf16.mxu1 %v1140_v9  ;;  %v1156_v25 = vld [vmem:[%s1502_s2 + $0xc8] sm:$0xff]   ;;  %v1160_v30 = vld [vmem:[%s1502_s2 + $0xc0] sm:$0xff]   ;;  %v1165_v46 = vld [vmem:[%s1502_s2 + $0x130] sm:$0xff]  }
   0xb   :  { %v1157_v26 = vld [vmem:[%s1502_s2 + $0x8] sm:$0xff]   ;;  %v1161_v31 = vld [vmem:[%s1502_s2] sm:$0xff]  }
   0xc   :  { %996 = vmatpush3.bf16.msra.mxu0 %v1141_v10  ;;  %v1158_v27 = vld [vmem:[%s1502_s2 + $0x88] sm:$0xff]   ;;  %v1162_v32 = vld [vmem:[%s1502_s2 + $0x80] sm:$0xff]  }
   0xd   :  { %1018 = vmatpush3.bf16.msra.mxu1 %v1142_v11  ;;  %997 = vmatprep.subr.bf16.mxu0 %v1143_v12  ;;  %v25_v33 = vld [vmem:[%s1500_s0] sm:$0xff]  ;;  %v1166_v47 = vld [vmem:[%s1502_s2 + $0x128] sm:$0xff]  }
   0xe   :  { %1019 = vmatprep.subr.bf16.mxu1 %v1144_v13  ;;  %v109_v39 = vcombine.high %v25_v33, %v25_v33  ;;  %v116_v41 = vrot.slane %v25_v33, %v1358_v40 }
  0x10   :  { %998 = vmatpush3.bf16.msra.mxu0 %v1145_v14  ;;  %v123_v42 = vrot.slane %v109_v39, %v1358_v40  ;;  %v124_v44 = vcombine.high %v116_v41, %v116_v41 }
  0x11   :  { %1020 = vmatpush3.bf16.msra.mxu1 %v1146_v15  ;;  %999 = vmatprep.subr.bf16.mxu0 %v1147_v16 }
  0x12   :  { %1021 = vmatprep.subr.bf16.mxu1 %v1148_v17  ;;  %v125_v45 = vcombine.high %v123_v42, %v123_v42  ;;  %410 = vmatprep.mubr.bf16.mxu0 %v124_v44 }
  0x14   :  { %1000 = vmatpush3.bf16.msra.mxu0 %v1149_v18  ;;  %450 = vmatprep.mubr.bf16.mxu1 %v125_v45 }
  0x15   :  { %1022 = vmatpush3.bf16.msra.mxu1 %v1150_v19  ;;  %1001 = vmatprep.subr.bf16.mxu0 %v1151_v20 }
  0x16   :  { %1023 = vmatprep.subr.bf16.mxu1 %v1152_v21 }
  0x18   :  { %1002 = vmatpush3.bf16.msra.mxu0 %v1153_v22 }
  0x19   :  { %1024 = vmatpush3.bf16.msra.mxu1 %v1154_v23  ;;  %1003 = vmatprep.subr.bf16.mxu0 %v1155_v24 }
  0x1a   :  { %1025 = vmatprep.subr.bf16.mxu1 %v1156_v25 }
  0x1c   :  { %1004 = vmatpush3.bf16.msra.mxu0 %v1157_v26 }
  0x1d   :  { %1026 = vmatpush3.bf16.msra.mxu1 %v1158_v27  ;;  %1005 = vmatprep.subr.bf16.mxu0 %v1159_v28 }
  0x1e   :  { %1027 = vmatprep.subr.bf16.mxu1 %v1160_v30 }
  0x20   :  { %1006 = vmatpush3.bf16.msra.mxu0 %v1161_v31 }
  0x21   :  { %1028 = vmatpush3.bf16.msra.mxu1 %v1162_v32  ;;  %1062 = vmatprep.subr.bf16.mxu0 %v1211_v37 }
  0x22   :  { %1082 = vmatprep.subr.bf16.mxu1 %v1211_v37 }
  0x23   :  { %411 = vmatmul.mubr.bf16.vlgmr.msra.gmra.mxu0 %v116_v41 }
  0x24   :  { %451 = vmatmul.mubr.bf16.vlgmr.msra.gmra.mxu1 %v123_v42  ;;  %1063 = vmatpush3.bf16.msra.mxu0 %v1164_v43 }
  0x25   :  { %1078 = vmatprep.mubr.msk.bf16.mxu0 %vm1212_vm0, %v1211_v37  ;;  %1064 = vmatprep.subr.bf16.mxu0 %v1211_v37 }
  0x26   :  { %1098 = vmatprep.mubr.msk.bf16.mxu1 %vm1212_vm0, %v1211_v37 }
  0x28   :  { %1065 = vmatpush3.bf16.msra.mxu0 %v1165_v46 }
  0x29   :  { %1066 = vmatprep.subr.bf16.mxu0 %v1211_v37 }
  0x2a   :  { %11 = vsyncpa [#allocation3], 0  ;;  %v1167_v48 = vld [vmem:[%s1502_s2 + $0x120] sm:$0xff]   ;;  %v1168_v49 = vld [vmem:[%s1502_s2 + $0x118] sm:$0xff]   ;;  %v1213_v60 = vmov 0   ;;  %v533_v28 = vsub.s32 0, %v1353_v34 }
  0x2b   :  { %v1169_v50 = vld [vmem:[%s1502_s2 + $0x110] sm:$0xff]   ;;  %v1170_v51 = vld [vmem:[%s1502_s2 + $0x108] sm:$0xff]   ;;  %v1171_v52 = vld [vmem:[%s1502_s2 + $0x100] sm:$0xff]   ;;  %1130 = vset.pattern.permute.xlu0 %v1213_v60  ;;  %v1214_v12 = vmov 1966171168   ;;  %vm876_vm2 = vcmask 27648  }
  0x2c   :  { %1067 = vmatpush3.bf16.msra.mxu0 %v1166_v47  ;;  %v931_v53 = vld.sshfl [vmem:[%s1500_s0 + $0x8] sm:$0x3 pattern:$0x76325410]  ;;  %v1172_v54 = vld [vmem:[%s1503_s3 + $0x38] sm:$0xff]   ;;  %v1173_v55 = vld [vmem:[%s1503_s3 + $0x30] sm:$0xff]   ;;  %v501_v13 = vunpack.c.l.s4 %v1214_v12 }
  0x2d   :  { %1068 = vmatprep.subr.bf16.mxu0 %v1211_v37  ;;  %1083 = vmatpush3.bf16.msra.mxu1 %v1172_v54  ;;  %v1174_v56 = vld [vmem:[%s1503_s3 + $0x28] sm:$0xff]   ;;  %v1175_v57 = vld [vmem:[%s1503_s3 + $0x20] sm:$0xff]   ;;  %v1176_v58 = vld [vmem:[%s1503_s3 + $0x18] sm:$0xff]   ;;  %vm909_vm3 = vcmask 1041409   ;;  %vm911_vm4 = vcmask 1042434   ;;  %vm913_vm5 = vcmask 1043459  }
  0x2e   :  { %1084 = vmatprep.subr.bf16.mxu1 %v1211_v37  ;;  %v1177_v59 = vld [vmem:[%s1503_s3 + $0x10] sm:$0xff]   ;;  %v1178_v61 = vld [vmem:[%s1503_s3 + $0x8] sm:$0xff]   ;;  %v1179_v62 = vld [vmem:[%s1503_s3] sm:$0xff]   ;;  %v502_v16 = vunpack.c.0.s8 %v501_v13 }
  0x2f   :  { %v1180_v63 = vld [vmem:[%s1505_s5 + $0x38] sm:$0xff]   ;;  %v1181_v0 = vld [vmem:[%s1505_s5 + $0x30] sm:$0xff]   ;;  %v1182_v1 = vld [vmem:[%s1505_s5 + $0x28] sm:$0xff]  }
  0x30   :  { %1069 = vmatpush3.bf16.msra.mxu0 %v1167_v48  ;;  %v1183_v2 = vld [vmem:[%s1505_s5 + $0x20] sm:$0xff]   ;;  %v1184_v3 = vld [vmem:[%s1505_s5 + $0x18] sm:$0xff]   ;;  %v505_v20 = vsub.s32 %v502_v16, %v1353_v34 }
  0x31   :  { %1070 = vmatprep.subr.bf16.mxu0 %v1211_v37  ;;  %1085 = vmatpush3.bf16.msra.mxu1 %v1173_v55  ;;  %v526_v44 = vld [vmem:[%s1501_s1] sm:$0x3] }
  0x32   :  { %1086 = vmatprep.subr.bf16.mxu1 %v1211_v37 }
  0x34   :  { %1071 = vmatpush3.bf16.msra.mxu0 %v1168_v49 }
  0x35   :  { %1072 = vmatprep.subr.bf16.mxu0 %v1211_v37  ;;  %1087 = vmatpush3.bf16.msra.mxu1 %v1174_v56 }
  0x36   :  { %1088 = vmatprep.subr.bf16.mxu1 %v1211_v37 }
  0x38   :  { %1073 = vmatpush3.bf16.msra.mxu0 %v1169_v50 }
  0x39   :  { %1074 = vmatprep.subr.bf16.mxu0 %v1211_v37  ;;  %1089 = vmatpush3.bf16.msra.mxu1 %v1175_v57 }
  0x3a   :  { %1090 = vmatprep.subr.bf16.mxu1 %v1211_v37 }
  0x3c   :  { %1075 = vmatpush3.bf16.msra.mxu0 %v1170_v51 }
  0x3d   :  { %1076 = vmatprep.subr.bf16.mxu0 %v1211_v37  ;;  %1091 = vmatpush3.bf16.msra.mxu1 %v1176_v58 }
  0x3e   :  { %1092 = vmatprep.subr.bf16.mxu1 %v1211_v37 }
  0x40   :  { %1077 = vmatpush3.bf16.msra.mxu0 %v1171_v52 }
  0x41   :  { %1102 = vmatprep.subr.bf16.mxu0 %v1211_v37  ;;  %1093 = vmatpush3.bf16.msra.mxu1 %v1177_v59 }
  0x42   :  { %1094 = vmatprep.subr.bf16.mxu1 %v1211_v37 }
  0x43   :  { %1079 = vmatmul.mubr.bf16.vlgmr.msra.gmra.mxu0 %v931_v53 }
  0x44   :  { %1118 = vmatprep.mubr.msk.bf16.mxu0 %vm1212_vm0, %v1211_v37  ;;  %1103 = vmatpush3.bf16.msra.mxu0 %v1180_v63 }
  0x45   :  { %1095 = vmatpush3.bf16.msra.mxu1 %v1178_v61  ;;  %1104 = vmatprep.subr.bf16.mxu0 %v1211_v37 }
  0x46   :  { %1096 = vmatprep.subr.bf16.mxu1 %v1211_v37 }
  0x48   :  { %1105 = vmatpush3.bf16.msra.mxu0 %v1181_v0 }
  0x49   :  { %1097 = vmatpush3.bf16.msra.mxu1 %v1179_v62  ;;  %1106 = vmatprep.subr.bf16.mxu0 %v1211_v37 }
  0x4c   :  { %1107 = vmatpush3.bf16.msra.mxu0 %v1182_v1 }
  0x4d   :  { %1108 = vmatprep.subr.bf16.mxu0 %v1211_v37 }
  0x50   :  { %1109 = vmatpush3.bf16.msra.mxu0 %v1183_v2 }
  0x51   :  { %1110 = vmatprep.subr.bf16.mxu0 %v1211_v37 }
  0x54   :  { %1111 = vmatpush3.bf16.msra.mxu0 %v1184_v3  ;;  %v1185_v3 = vld [vmem:[%s1505_s5 + $0x10] sm:$0xff]  }
  0x55   :  { %1112 = vmatprep.subr.bf16.mxu0 %v1211_v37 }
  0x58   :  { %1113 = vmatpush3.bf16.msra.mxu0 %v1185_v3 }
  0x59   :  { %1114 = vmatprep.subr.bf16.mxu0 %v1211_v37 }
  0xe3   :  { %v1007_v4 = vpop.f32.mrf.mxu0 }
  0xe4   :  { %v1029_v5 = vpop.f32.mrf.mxu1 }
  0xe5   :  { %v1008_v6 = vpop.f32.mrf.mxu0 }
  0xe6   :  { %v1030_v7 = vpop.f32.mrf.mxu1  ;;  %v1009_v14 = vadd.f32 %v1008_v6, %v1007_v4  ;;  %v1186_v4 = vld [vmem:[%s1505_s5 + $0x8] sm:$0xff]  }
  0xe7   :  { %v1010_v8 = vpop.f32.mrf.mxu0  ;;  %v1031_v15 = vadd.f32 %v1030_v7, %v1029_v5  ;;  %1115 = vmatpush3.bf16.msra.mxu0 %v1186_v4 }
  0xe8   :  { %v1032_v9 = vpop.f32.mrf.mxu1  ;;  %1116 = vmatprep.subr.bf16.mxu0 %v1211_v37 }
  0xe9   :  { %v1011_v10 = vpop.f32.mrf.mxu0  ;;  %v453_v17 = vadd.f32 %v1031_v15, %v1009_v14 }
  0xea   :  { %v1033_v11 = vpop.f32.mrf.mxu1 }
 0x103   :  { %v492_v18 = vpop.f32.mrf.mxu0 }
 0x104   :  { %v493_v19 = vadd.f32 %v492_v18, %v453_v17  ;;  %v1215_v17 = vmov 839922192  }
 0x105   :  { %v1080_v21 = vpop.f32.mrf.mxu0  ;;  %v834_v18 = vunpack.c.l.s4 %v1215_v17 }
 0x106   :  { %v498_v22 = vpack.c.bf16 %v493_v19, %v493_v19  ;;  %v1216_v19 = vmov 1985246804  }
 0x107   :  { %v495_v23 = vpop.f32.mrf.mxu0  ;;  %v835_v21 = vunpack.c.0.s8 %v834_v18 }
 0x108   :  { %v506_v24 = vrot.slane %v498_v22, %v505_v20  ;;  %v868_v23 = vand.u32 127, %v113_v29 }
 0x109   :  { %v1081_v25 = vpop.f32.mrf.mxu0 }
 0x10a   :  { %v507_v26 = vcombine.high %v506_v24, %v506_v24  ;;  %v514_v27 = vrot.slane %v506_v24, %v505_v20  ;;  %v838_v24 = vsub.s32 %v835_v21, %v1353_v34  ;;  %vm869_vm1 = vcmp.eq.s32.totalorder %v1353_v34, %v868_v23 }
 0x10c   :  { %v521_v30 = vrot.slane %v507_v26, %v505_v20  ;;  %v523_v31 = vunpack.i.h.s16 %v514_v27  ;;  %v972_v32 = vpack.i.b16 %v514_v27, %v514_v27  ;;  %v841_v20 = vunpack.c.l.s4 %v1216_v19 }
 0x10e   :  { %v525_v33 = vunpack.i.h.s16 %v521_v30  ;;  %v528_v35 = vpack.i.b16 %v523_v31, %v523_v31  ;;  %v973_v36 = vpack.i.b16 %v521_v30, %v521_v30  ;;  %v534_v38 = vrot.slane %v972_v32, %v533_v28 }
 0x10f   :  { %v842_v22 = vunpack.c.0.s8 %v841_v20 }
 0x110   :  { %v530_v39 = vpack.i.b16 %v525_v33, %v525_v33  ;;  %v538_v41 = vrot.slane %v528_v35, %v533_v28  ;;  %v542_v42 = vrot.slane %v973_v36, %v533_v28  ;;  %v548_v43 = vpack.i.b16 %v534_v38, %v534_v38 }
 0x111   :  { %v845_v25 = vsub.s32 %v842_v22, %v1353_v34 }
 0x112   :  { %v546_v45 = vrot.slane %v530_v39, %v533_v28  ;;  %v553_v46 = vrot.slane %v548_v43, %v533_v28  ;;  %v555_v47 = vpack.i.b16 %v538_v41, %v538_v41  ;;  %v562_v48 = vpack.i.b16 %v542_v42, %v542_v42 }
 0x114   :  { %v560_v49 = vrot.slane %v555_v47, %v533_v28  ;;  %v567_v50 = vrot.slane %v562_v48, %v533_v28  ;;  %v569_v51 = vpack.i.b16 %v546_v45, %v546_v45  ;;  %v575_v52 = vadd.bf16 %v553_v46, %v526_v44 }
 0x116   :  { %v574_v53 = vrot.slane %v569_v51, %v533_v28  ;;  %v576_v54 = vadd.bf16 %v560_v49, %v526_v44  ;;  %v577_v55 = vadd.bf16 %v567_v50, %v526_v44  ;;  %v579_v57 = vmax.bf16 %v1213_v60, %v575_v52 }
 0x118   :  { %v578_v56 = vadd.bf16 %v574_v53, %v526_v44  ;;  %v580_v58 = vmax.bf16 %v1213_v60, %v576_v54  ;;  %v581_v59 = vmax.bf16 %v1213_v60, %v577_v55 }
 0x11a   :  { %v582_v61 = vmax.bf16 %v1213_v60, %v578_v56  ;;  %v610_v62 = vcombine.low %v579_v57, %v580_v58  ;;  %v974_v60 = vld [vmem:[%s1504_s4] ss:$0 sm:$0xff]  ;;  %s1217_s4 = smov [#allocation2]  }
 0x11c   :  { %v611_v63 = vcombine.low %v581_v59, %v582_v61  ;;  %v618_v0 = vrot.slane %v610_v62, %v1358_v40 }
 0x11e   :  { %v625_v1 = vrot.slane %v611_v63, %v1358_v40  ;;  %v1187_v40 = vld [vmem:[%s1505_s5] sm:$0xff]   ;;  %s923_s5 = sshll.u32 %s1217_s4, 4  ;;  %s924_s5 = int_to_ptr.vmem [resolvable:$true] %s923_s5 }
 0x11f   :  { %1117 = vmatpush3.bf16.msra.mxu0 %v1187_v40  ;;  %s1188_s15 = scalar_lea.vmem %s924_s5, 64  ;;  %p1193_p1 = scmp.lt.s32.totalorder %s924_s5, %s924_s5 }
 0x120   :  { %v626_v2 = vcombine.low %v618_v0, %v625_v1  ;;  %p1189_p0 = scmp.ne.s32.totalorder %s924_s5, %s1188_s15  ;;  %p1194_p2 = scmp.lt.s32.totalorder %s1188_s15, %s1188_s15 }
 0x122   :  { %1099 = vmatmul.mubr.bf16.vlgmr.msra.gmra.mxu1 %v626_v2  ;;  %p1195_p3 = por %p1194_p2, %p1193_p1 }
 0x124   :  { %p1196_p4 = pnand %p1195_p3, %p1189_p0 }
 0x1e2   :  { %v710_v5 = vpop.f32.mrf.mxu1 }
 0x1e3   :  { %v711_v7 = vadd.f32 %v974_v60, %v710_v5 }
 0x1e4   :  { %v1100_v6 = vpop.f32.mrf.mxu1 }
 0x1e5   :  { %v717_v11 = vmax.f32 %v711_v7, 0.0 }
 0x1e6   :  { %v713_v8 = vpop.f32.mrf.mxu1 }
 0x1e7   :  { %v714_v9 = vadd.f32 %v974_v60, %v713_v8 }
 0x1e8   :  { %v1101_v10 = vpop.f32.mrf.mxu1 }
 0x1e9   :  { %v718_v12 = vmax.f32 %v714_v9, 0.0 }
 0x1eb   :  { %v719_v13 = vpack.c.bf16 %v718_v12, %v717_v11 }
 0x1ed   :  { %1119 = vmatmul.mubr.bf16.vlgmr.msra.gmra.mxu0 %v719_v13 }
 0x2ad   :  { %v818_v37 = vpop.f32.mrf.mxu0 }
 0x2ae   :  { %827 = vperm.xlu0 %1130, %v818_v37  }
 0x2af   :  { %v1120_v14 = vpop.f32.mrf.mxu0 }
 0x2b1   :  { %v821_v15 = vpop.f32.mrf.mxu0 }
 0x2b2   :  { %831 = vperm.xlu0 %1130, %v821_v15  }
 0x2b3   :  { %v1121_v16 = vpop.f32.mrf.mxu0 }
 0x329   :  { %v828_v26 = vpop.permute.xlu0 %827 }
 0x32a   :  { %v839_v27 = vrot.slane %v828_v26, %v838_v24  ;;  %v846_v28 = vrot.slane %v828_v26, %v845_v25 }
 0x32c   :  { %v872_v30 = vsel %vm869_vm1, %v839_v27, 0.0  ;;  %v873_v31 = vsel %vm869_vm1, %v846_v28, 0.0 }
 0x32d   :  { %v877_v32 = vsel %vm876_vm2, %v872_v30, 0.0  ;;  %v884_v29 = vsel %vm876_vm2, %v873_v31, 0.0  ;;  %v832_v33 = vpop.permute.xlu0 %831 }
 0x32e   :  { %v878_v35 = vrot.slane %v877_v32, 4  ;;  %v885_v36 = vrot.slane %v884_v29, 4  ;;  %v853_v38 = vrot.slane %v832_v33, %v838_v24  ;;  %v860_v39 = vrot.slane %v832_v33, %v845_v25 }
 0x330   :  { %v879_v41 = vadd.f32 %v878_v35, %v877_v32  ;;  %v886_v42 = vadd.f32 %v885_v36, %v884_v29  ;;  %v874_v43 = vsel %vm869_vm1, %v853_v38, 0.0  ;;  %v875_v44 = vsel %vm869_vm1, %v860_v39, 0.0 }
 0x331   :  { %v891_v45 = vsel %vm876_vm2, %v874_v43, 0.0  ;;  %v898_v46 = vsel %vm876_vm2, %v875_v44, 0.0 }
 0x332   :  { %v880_v47 = vrot.slane %v879_v41, 2  ;;  %v887_v48 = vrot.slane %v886_v42, 2  ;;  %v892_v49 = vrot.slane %v891_v45, 4  ;;  %v899_v50 = vrot.slane %v898_v46, 4 }
 0x334   :  { %v881_v51 = vadd.f32 %v880_v47, %v879_v41  ;;  %v888_v52 = vadd.f32 %v887_v48, %v886_v42  ;;  %v893_v53 = vadd.f32 %v892_v49, %v891_v45  ;;  %v900_v54 = vadd.f32 %v899_v50, %v898_v46 }
 0x336   :  { %v882_v55 = vrot.slane %v881_v51, 1  ;;  %v889_v56 = vrot.slane %v888_v52, 1  ;;  %v894_v57 = vrot.slane %v893_v53, 2  ;;  %v901_v58 = vrot.slane %v900_v54, 2 }
 0x338   :  { %v895_v59 = vadd.f32 %v894_v57, %v893_v53  ;;  %v902_v61 = vadd.f32 %v901_v58, %v900_v54  ;;  %v883_v34 = vadd.f32 %v882_v55, %v881_v51  ;;  %v890_v62 = vadd.f32 %v889_v56, %v888_v52 }
 0x33a   :  { %v896_v63 = vrot.slane %v895_v59, 1  ;;  %v903_v0 = vrot.slane %v902_v61, 1  ;;  %v910_v3 = vsel %vm909_vm3, %v890_v62, %v883_v34 }
 0x33c   :  { %v897_v1 = vadd.f32 %v896_v63, %v895_v59  ;;  %v904_v2 = vadd.f32 %v903_v0, %v902_v61 }
 0x33e   :  { %v912_v4 = vsel %vm911_vm4, %v897_v1, %v910_v3 }
 0x33f   :  { %v914_v40 = vsel %vm913_vm5, %v904_v2, %v912_v4 }
 0x340   :  { %916 = vst.msk [vmem:[#allocation2] sm:$0xf] %vm876_vm2, %v914_v40 }
 0x341   :  { %1199 = shalt.err (!%p1196_p4)
}
 0x342   :  { %926 = dma.vmem_to_hbm [thread:$0]  %s924_s5, 64, %s1506_s6, [#allocation3]  }
 0x343   :  { %1208 = dma.done.wait [#allocation3], 64  }
 0x344   :  { %1209 = vsyncadd [#allocation3], 4294967232 }
 0x345   :  { %930 = vsyncpa [#allocation3], 1 }

</bundles_post_ra>
